<compile_context>
chip_gen: v6e
topology: v6e:2x2x1
jax: 0.10.0
libtpu: 0.0.40
codegen_flags: <defaults>
</compile_context>

<pallas_src>
import functools

import jax
import jax.numpy as jnp
from jax.experimental import pallas as pl
from jax.experimental.pallas import tpu as pltpu

BN_EPS = 1e-5
_LANE = 128


def _round_up(x, m):
    return (x + m - 1) // m * m


def _vmem_limit(per_step_bytes):
    """VMEM limit derived from double-buffered tile bytes, per generation."""
    try:
        cap = int(pltpu.get_tpu_info().vmem_capacity_bytes)
    except Exception:
        cap = 64 * 1024 * 1024          # assume smallest (v7x per-TC) if unknown
    ceiling = int(cap * 0.6)            # leave >=40% for compiler scratch/spill
    want = 2 * int(per_step_bytes) + (8 << 20)
    return int(max(16 << 20, min(want, ceiling)))


def _pick_row_tile(n_rows, row_multiple, bytes_per_row, target_bytes):
    """Largest divisor d of n_rows with (d*row_multiple) 8-aligned (or d == n_rows)
    whose tile fits the byte budget; smallest feasible otherwise."""
    feasible = [d for d in range(1, n_rows + 1)
                if n_rows % d == 0 and ((d * row_multiple) % 8 == 0 or d == n_rows)]
    under = [d for d in feasible if d * bytes_per_row <= target_bytes]
    return max(under) if under else min(feasible)


def _conv_stats_kernel(x_ref, w_ref, y_ref, stats_ref, *,
                       kh, kw, stride, dilation, toh, ow, c, fuse):
    """Direct conv for one (image, row-tile, OC-tile) + partial BN statistics.

    x_ref:     (1, S2, HPs, WPs, C)   compute dtype, phase-split padded NHWC
    w_ref:     (KH*KW*C, OC_TILE)     compute dtype, OC zero-padded
    y_ref:     (1, TOH*OW, OC_TILE)   raw conv output (f32 or bf16)
    stats_ref: (1, 1, 2, OC_TILE)     f32 [sum(y), sum(y*y)] of this tile
    """
    r = pl.program_id(1)
    rows = toh * ow
    row0 = pl.multiple_of(r * toh, toh)

    # Gather the KH*KW taps as contiguous (TOH, OW, C) windows; the wrapper's
    # space-to-batch phase split keeps them contiguous even for stride > 1.
    taps = []
    for i in range(kh):
        hq, ph = (i * dilation) // stride, (i * dilation) % stride
        for j in range(kw):
            wq, pw = (j * dilation) // stride, (j * dilation) % stride
            taps.append(x_ref[0, ph * stride + pw,
                              pl.ds(row0 + hq, toh), pl.ds(wq, ow), :])

    if fuse:
        # One fat-K MXU matmul (K = KH*KW*C) instead of KH*KW K=C matmuls.
        lhs = taps[0] if len(taps) == 1 else jnp.concatenate(taps, axis=-1)
        acc = jnp.dot(lhs.reshape(rows, kh * kw * c), w_ref[...],
                      preferred_element_type=jnp.float32)
    else:
        # Fallback for channel-rich layers (K = C already fills the MXU).
        acc = jnp.zeros((rows, w_ref.shape[-1]), jnp.float32)
        for t, tap in enumerate(taps):
            acc = acc + jnp.dot(tap.reshape(rows, c),
                                w_ref[pl.ds(t * c, c), :],
                                preferred_element_type=jnp.float32)

    y_ref[0] = acc.astype(y_ref.dtype)
    # Partial BN statistics from the un-quantized f32 accumulator; two row
    # stores (no in-kernel concat of the stats block).
    stats_ref[0, 0, 0:1, :] = jnp.sum(acc, axis=0, keepdims=True)
    stats_ref[0, 0, 1:2, :] = jnp.sum(acc * acc, axis=0, keepdims=True)


def _bn_apply_kernel(y_ref, scale_ref, shift_ref, o_ref):
    """BN epilogue with the affine folded in: out = y * scale + shift."""
    y = y_ref[0].astype(jnp.float32)
    o_ref[0] = (y * scale_ref[...] + shift_ref[...]).astype(o_ref.dtype)


def conv_bn_forward(x, weight, gamma, beta, *, stride=1, padding=0, dilation=1,
                    groups=1, compute_dtype=jnp.bfloat16, eps=BN_EPS,
                    out_layout="NCHW"):
    """Forward of _ConvBN.  x: (N,C,H,W) f32; weight: (OC,C,KH,KW). Returns f32.

    compute_dtype feeds the MXU (bf16 halves HBM/VMEM traffic and ~2x MXU
    throughput on v6e/v7x); accumulation, BN statistics and the epilogue stay
    in f32.  On the bf16 path the conv intermediate is stored as bf16.
    """
    assert groups == 1, "groups != 1 not supported"  # TODO(synk): grouped conv.
    n, c, h, w = x.shape
    oc, c_w, kh, kw = weight.shape
    assert c == c_w

    oh = (h + 2 * padding - dilation * (kh - 1) - 1) // stride + 1
    ow = (w + 2 * padding - dilation * (kw - 1) - 1) // stride + 1

    # Lane-dense output channels; 256-wide OC tiles when OC > 128 to drive the
    # full 256-wide MXU on v6e/v7x (128 is already optimal for v5e / small OC).
    ocp = _round_up(oc, _LANE)
    if ocp > 256:
        ocp = _round_up(oc, 256)
        octile = 256
    else:
        octile = ocp
    noct = ocp // octile

    in_dt = jnp.dtype(compute_dtype)
    y_dt = jnp.bfloat16 if in_dt == jnp.dtype(jnp.bfloat16) else jnp.float32
    y_item = jnp.dtype(y_dt).itemsize

    # Cast BEFORE the layout ops so transpose/pad move bf16 bytes, then
    # NCHW -> padded NHWC (this, not an im2col matrix, is what the kernel reads).
    xp = jnp.pad(jnp.transpose(x.astype(compute_dtype), (0, 2, 3, 1)),
                 ((0, 0), (padding, padding), (padding, padding), (0, 0)))

    # Space-to-batch phase split so every in-kernel tap slice is contiguous.
    s2 = stride * stride
    hps = oh + (dilation * (kh - 1)) // stride
    wps = ow + (dilation * (kw - 1)) // stride
    if stride == 1:
        xph = xp[:, None]                              # (N, 1, HP, WP, C)
    else:
        phases = []
        for ph in range(stride):
            for pw in range(stride):
                sl = xp[:, ph::stride, pw::stride, :][:, :hps, :wps, :]
                sl = jnp.pad(sl, ((0, 0), (0, hps - sl.shape[1]),
                                  (0, wps - sl.shape[2]), (0, 0)))
                phases.append(sl)
        xph = jnp.stack(phases, axis=1)                # (N, S2, HPs, WPs, C)

    # (OC,C,KH,KW) -> (KH*KW*C, OCp); OC zero-padded so padded lanes stay 0.
    w_t = jnp.transpose(weight, (2, 3, 1, 0)).reshape(kh * kw * c, oc)
    w_t = jnp.pad(w_t, ((0, 0), (0, ocp - oc))).astype(compute_dtype)

    # Fuse taps into one matmul whenever C is small (K-starved MXU otherwise).
    fuse = c <= 128 and kh * kw * c <= 1024
    k_fused = kh * kw * c if fuse else c

    # Row tiling: bound the per-step accumulator / patch / output tile.
    bytes_per_row = ow * (octile * 4 + octile * y_item + k_fused * in_dt.itemsize)
    toh = _pick_row_tile(oh, ow, bytes_per_row, target_bytes=4 << 20)
    nrt = oh // toh

    per_step1 = (s2 * hps * wps * c * in_dt.itemsize
                 + kh * kw * c * octile * in_dt.itemsize
                 + toh * bytes_per_row + 2 * octile * 4)
    flops1 = 2 * n * oh * ow * kh * kw * c * ocp
    bytes1 = (int(xph.size) * in_dt.itemsize + int(w_t.size) * in_dt.itemsize
              + n * oh * ow * ocp * y_item + n * nrt * 2 * ocp * 4)

    # ---- Pass 1: conv + partial BN stats; grid (N, row tiles, OC tiles) ----
    conv_out, partial = pl.pallas_call(
        functools.partial(_conv_stats_kernel, kh=kh, kw=kw, stride=stride,
                          dilation=dilation, toh=toh, ow=ow, c=c, fuse=fuse),
        out_shape=(jax.ShapeDtypeStruct((n, oh * ow, ocp), y_dt),
                   jax.ShapeDtypeStruct((n, nrt, 2, ocp), jnp.float32)),
        grid=(n, nrt, noct),
        in_specs=[
            pl.BlockSpec((1, s2, hps, wps, c), lambda b, r, t: (b, 0, 0, 0, 0)),
            pl.BlockSpec((kh * kw * c, octile), lambda b, r, t: (0, t)),
        ],
        out_specs=(
            pl.BlockSpec((1, toh * ow, octile), lambda b, r, t: (b, r, t)),
            pl.BlockSpec((1, 1, 2, octile), lambda b, r, t: (b, r, 0, t)),
        ),
        compiler_params=pltpu.CompilerParams(
            dimension_semantics=("parallel", "parallel", "parallel"),
            vmem_limit_bytes=_vmem_limit(per_step1)),
        cost_estimate=pl.CostEstimate(flops=int(flops1), transcendentals=0,
                                      bytes_accessed=int(bytes1)),
    )(xph, w_t)

    # ---- Finalize training-mode BN stats; fold the affine into scale/shift ----
    # Padded channels: sums = 0 -> var = 0 -> rsqrt(eps) finite, gamma_pad = 0
    # zeroes them; they are sliced off below.
    m_total = float(n * oh * ow)
    sums = jnp.sum(partial[:, :, 0, :], axis=(0, 1))
    sqs = jnp.sum(partial[:, :, 1, :], axis=(0, 1))
    mean = sums / m_total
    var = jnp.maximum(sqs / m_total - mean * mean, 0.0)
    gamma_p = jnp.pad(gamma.astype(jnp.float32), (0, ocp - oc))
    beta_p = jnp.pad(beta.astype(jnp.float32), (0, ocp - oc))
    scale_v = gamma_p * jax.lax.rsqrt(var + eps)
    shift_v = beta_p - mean * scale_v
    scale = scale_v.reshape(1, ocp)
    shift = shift_v.reshape(1, ocp)
    # TODO(synk): running_mean / running_var momentum update not implemented.

    # ---- Pass 2: row-tiled, lane-dense epilogue out = y*scale + shift ----
    bytes_per_row2 = ocp * (y_item + 4)
    r2 = _pick_row_tile(oh * ow, 1, bytes_per_row2, target_bytes=4 << 20)
    nrt2 = (oh * ow) // r2
    per_step2 = r2 * bytes_per_row2 + 2 * ocp * 4
    flops2 = 2 * n * oh * ow * ocp
    bytes2 = n * oh * ow * ocp * (y_item + 4) + 2 * ocp * 4

    out = pl.pallas_call(
        _bn_apply_kernel,
        out_shape=jax.ShapeDtypeStruct((n, oh * ow, ocp), jnp.float32),
        grid=(n, nrt2),
        in_specs=[
            pl.BlockSpec((1, r2, ocp), lambda b, r: (b, r, 0)),
            pl.BlockSpec((1, ocp), lambda b, r: (0, 0)),
            pl.BlockSpec((1, ocp), lambda b, r: (0, 0)),
        ],
        out_specs=pl.BlockSpec((1, r2, ocp), lambda b, r: (b, r, 0)),
        compiler_params=pltpu.CompilerParams(
            dimension_semantics=("parallel", "parallel"),
            vmem_limit_bytes=_vmem_limit(per_step2)),
        cost_estimate=pl.CostEstimate(flops=int(flops2), transcendentals=0,
                                      bytes_accessed=int(bytes2)),
    )(conv_out, scale, shift)

    # (N, OH*OW, OCp) -> drop padded channels -> requested layout.
    out = out.reshape(n, oh, ow, ocp)[..., :oc]
    if out_layout == "NHWC":
        return out                    # skip the NCHW round-trip when allowed
    return jnp.transpose(out, (0, 3, 1, 2))


def _reference(x, weight, gamma, beta, *, stride, padding, dilation):
    """Pure-JAX reference: lax conv + training-mode BatchNorm2d."""
    y = jax.lax.conv_general_dilated(
        x, weight,
        window_strides=(stride, stride),
        padding=[(padding, padding), (padding, padding)],
        rhs_dilation=(dilation, dilation),
        dimension_numbers=("NCHW", "OIHW", "NCHW"),
        precision=jax.lax.Precision.HIGHEST)
    mean = jnp.mean(y, axis=(0, 2, 3), keepdims=True)
    var = jnp.mean((y - mean) ** 2, axis=(0, 2, 3), keepdims=True)
    yhat = (y - mean) * jax.lax.rsqrt(var + BN_EPS)
    return yhat * gamma.reshape(1, -1, 1, 1) + beta.reshape(1, -1, 1, 1)


if __name__ == "__main__":
    # Shapes consistent with _ConvBN(in=4, out=8, kernel=3, stride=1, padding=1).
    N, C, H, W = 2, 4, 16, 16
    OC, KH, KW = 8, 3, 3
    stride, padding, dilation = 1, 1, 1

    key = jax.random.PRNGKey(0)
    kx, kw_, kg, kb = jax.random.split(key, 4)
    x = jax.random.normal(kx, (N, C, H, W), dtype=jnp.float32)
    weight = jax.random.normal(kw_, (OC, C, KH, KW), dtype=jnp.float32) * 0.1
    gamma = 1.0 + 0.1 * jax.random.normal(kg, (OC,), dtype=jnp.float32)
    beta = 0.1 * jax.random.normal(kb, (OC,), dtype=jnp.float32)

    ref = _reference(x, weight, gamma, beta, stride=stride, padding=padding,
                     dilation=dilation)

    # f32 MXU path: tight check of the conv / BN wiring.
    out_f32 = jax.block_until_ready(conv_bn_forward(
        x, weight, gamma, beta, stride=stride, padding=padding,
        dilation=dilation, compute_dtype=jnp.float32))
    assert out_f32.shape == (N, OC, H, W), out_f32.shape
    assert jnp.allclose(out_f32, ref, rtol=5e-3, atol=5e-3), \
        float(jnp.max(jnp.abs(out_f32 - ref)))

    # bf16 fast path (bf16 MXU inputs + bf16 conv intermediate, f32 stats).
    out_bf16 = jax.block_until_ready(conv_bn_forward(
        x, weight, gamma, beta, stride=stride, padding=padding,
        dilation=dilation, compute_dtype=jnp.bfloat16))
    assert out_bf16.shape == (N, OC, H, W), out_bf16.shape
    assert jnp.allclose(out_bf16, ref, rtol=5e-2, atol=5e-2), \
        float(jnp.max(jnp.abs(out_bf16 - ref)))

    print("KERNEL_OK")
</pallas_src>

<mosaic_0001>
module attributes {stable_mosaic.version = 11 : i64} {
  func.func @_conv_stats_kernel(%arg0: i32, %arg1: i32, %arg2: i32, %arg3: memref<1x1x18x18x4xf32, #tpu.memory_space<vmem>>, %arg4: memref<36x128xf32, #tpu.memory_space<vmem>>, %arg5: memref<1x256x128xf32, #tpu.memory_space<vmem>>, %arg6: memref<1x1x2x128xf32, #tpu.memory_space<vmem>>) attributes {dimension_semantics = [#tpu.dimension_semantics<parallel>, #tpu.dimension_semantics<parallel>, #tpu.dimension_semantics<parallel>], iteration_bounds = array<i64: 2, 1, 1>, scalar_prefetch = 0 : i64, scratch_operands = 0 : i64, tpu.core_type = #tpu.core_type<tc>, window_params = [{transform_indices = @transform_0, window_bounds = array<i64: 1, 1, 18, 18, 4>}, {transform_indices = @transform_1, window_bounds = array<i64: 36, 128>}, {transform_indices = @transform_2, window_bounds = array<i64: 1, 256, 128>}, {transform_indices = @transform_3, window_bounds = array<i64: 1, 1, 2, 128>}]} {
    %c16_i32 = arith.constant 16 : i32
    %0 = arith.muli %arg1, %c16_i32 : i32
    %1 = tpu.assume_multiple %0, 16 : i32
    %c0_i32 = arith.constant 0 : i32
    %2 = arith.addi %1, %c0_i32 : i32
    %c0 = arith.constant 0 : index
    %c0_0 = arith.constant 0 : index
    %3 = arith.index_cast %2 : i32 to index
    %c0_1 = arith.constant 0 : index
    %c0_2 = arith.constant 0 : index
    %4 = vector.load %arg3[%c0, %c0_0, %3, %c0_1, %c0_2] : memref<1x1x18x18x4xf32, #tpu.memory_space<vmem>>, vector<1x1x16x16x4xf32>
    %5 = vector.shape_cast %4 : vector<1x1x16x16x4xf32> to vector<16x16x4xf32>
    %c0_i32_3 = arith.constant 0 : i32
    %6 = arith.addi %1, %c0_i32_3 : i32
    %c0_4 = arith.constant 0 : index
    %c0_5 = arith.constant 0 : index
    %7 = arith.index_cast %6 : i32 to index
    %c1 = arith.constant 1 : index
    %c0_6 = arith.constant 0 : index
    %8 = vector.load %arg3[%c0_4, %c0_5, %7, %c1, %c0_6] : memref<1x1x18x18x4xf32, #tpu.memory_space<vmem>>, vector<1x1x16x16x4xf32>
    %9 = vector.shape_cast %8 : vector<1x1x16x16x4xf32> to vector<16x16x4xf32>
    %c0_i32_7 = arith.constant 0 : i32
    %10 = arith.addi %1, %c0_i32_7 : i32
    %c0_8 = arith.constant 0 : index
    %c0_9 = arith.constant 0 : index
    %11 = arith.index_cast %10 : i32 to index
    %c2 = arith.constant 2 : index
    %c0_10 = arith.constant 0 : index
    %12 = vector.load %arg3[%c0_8, %c0_9, %11, %c2, %c0_10] : memref<1x1x18x18x4xf32, #tpu.memory_space<vmem>>, vector<1x1x16x16x4xf32>
    %13 = vector.shape_cast %12 : vector<1x1x16x16x4xf32> to vector<16x16x4xf32>
    %c1_i32 = arith.constant 1 : i32
    %14 = arith.addi %1, %c1_i32 : i32
    %c0_11 = arith.constant 0 : index
    %c0_12 = arith.constant 0 : index
    %15 = arith.index_cast %14 : i32 to index
    %c0_13 = arith.constant 0 : index
    %c0_14 = arith.constant 0 : index
    %16 = vector.load %arg3[%c0_11, %c0_12, %15, %c0_13, %c0_14] : memref<1x1x18x18x4xf32, #tpu.memory_space<vmem>>, vector<1x1x16x16x4xf32>
    %17 = vector.shape_cast %16 : vector<1x1x16x16x4xf32> to vector<16x16x4xf32>
    %c1_i32_15 = arith.constant 1 : i32
    %18 = arith.addi %1, %c1_i32_15 : i32
    %c0_16 = arith.constant 0 : index
    %c0_17 = arith.constant 0 : index
    %19 = arith.index_cast %18 : i32 to index
    %c1_18 = arith.constant 1 : index
    %c0_19 = arith.constant 0 : index
    %20 = vector.load %arg3[%c0_16, %c0_17, %19, %c1_18, %c0_19] : memref<1x1x18x18x4xf32, #tpu.memory_space<vmem>>, vector<1x1x16x16x4xf32>
    %21 = vector.shape_cast %20 : vector<1x1x16x16x4xf32> to vector<16x16x4xf32>
    %c1_i32_20 = arith.constant 1 : i32
    %22 = arith.addi %1, %c1_i32_20 : i32
    %c0_21 = arith.constant 0 : index
    %c0_22 = arith.constant 0 : index
    %23 = arith.index_cast %22 : i32 to index
    %c2_23 = arith.constant 2 : index
    %c0_24 = arith.constant 0 : index
    %24 = vector.load %arg3[%c0_21, %c0_22, %23, %c2_23, %c0_24] : memref<1x1x18x18x4xf32, #tpu.memory_space<vmem>>, vector<1x1x16x16x4xf32>
    %25 = vector.shape_cast %24 : vector<1x1x16x16x4xf32> to vector<16x16x4xf32>
    %c2_i32 = arith.constant 2 : i32
    %26 = arith.addi %1, %c2_i32 : i32
    %c0_25 = arith.constant 0 : index
    %c0_26 = arith.constant 0 : index
    %27 = arith.index_cast %26 : i32 to index
    %c0_27 = arith.constant 0 : index
    %c0_28 = arith.constant 0 : index
    %28 = vector.load %arg3[%c0_25, %c0_26, %27, %c0_27, %c0_28] : memref<1x1x18x18x4xf32, #tpu.memory_space<vmem>>, vector<1x1x16x16x4xf32>
    %29 = vector.shape_cast %28 : vector<1x1x16x16x4xf32> to vector<16x16x4xf32>
    %c2_i32_29 = arith.constant 2 : i32
    %30 = arith.addi %1, %c2_i32_29 : i32
    %c0_30 = arith.constant 0 : index
    %c0_31 = arith.constant 0 : index
    %31 = arith.index_cast %30 : i32 to index
    %c1_32 = arith.constant 1 : index
    %c0_33 = arith.constant 0 : index
    %32 = vector.load %arg3[%c0_30, %c0_31, %31, %c1_32, %c0_33] : memref<1x1x18x18x4xf32, #tpu.memory_space<vmem>>, vector<1x1x16x16x4xf32>
    %33 = vector.shape_cast %32 : vector<1x1x16x16x4xf32> to vector<16x16x4xf32>
    %c2_i32_34 = arith.constant 2 : i32
    %34 = arith.addi %1, %c2_i32_34 : i32
    %c0_35 = arith.constant 0 : index
    %c0_36 = arith.constant 0 : index
    %35 = arith.index_cast %34 : i32 to index
    %c2_37 = arith.constant 2 : index
    %c0_38 = arith.constant 0 : index
    %36 = vector.load %arg3[%c0_35, %c0_36, %35, %c2_37, %c0_38] : memref<1x1x18x18x4xf32, #tpu.memory_space<vmem>>, vector<1x1x16x16x4xf32>
    %37 = vector.shape_cast %36 : vector<1x1x16x16x4xf32> to vector<16x16x4xf32>
    %38 = tpu.concatenate %5, %9, %13, %17, %21, %25, %29, %33, %37 in 2 : vector<16x16x4xf32>, vector<16x16x4xf32>, vector<16x16x4xf32>, vector<16x16x4xf32>, vector<16x16x4xf32>, vector<16x16x4xf32>, vector<16x16x4xf32>, vector<16x16x4xf32>, vector<16x16x4xf32> -> vector<16x16x36xf32>
    %39 = vector.shape_cast %38 : vector<16x16x36xf32> to vector<256x36xf32>
    %c0_39 = arith.constant 0 : index
    %c0_40 = arith.constant 0 : index
    %40 = vector.load %arg4[%c0_39, %c0_40] : memref<36x128xf32, #tpu.memory_space<vmem>>, vector<36x128xf32>
    %cst = arith.constant dense<0.000000e+00> : vector<256x128xf32>
    %41 = tpu.matmul %39, %40, %cst {dimension_numbers = #tpu.dot_dimension_numbers<[1], [0], [0], [1], [0, 0, 1, 1], [], []>} : vector<256x36xf32>, vector<36x128xf32>, vector<256x128xf32> -> vector<256x128xf32>
    %c0_41 = arith.constant 0 : index
    %c0_42 = arith.constant 0 : index
    %c0_43 = arith.constant 0 : index
    %42 = vector.load %arg5[%c0_41, %c0_42, %c0_43] : memref<1x256x128xf32, #tpu.memory_space<vmem>>, vector<1x256x128xf32>
    %43 = vector.shape_cast %42 : vector<1x256x128xf32> to vector<256x128xf32>
    %44 = vector.shape_cast %41 : vector<256x128xf32> to vector<1x256x128xf32>
    tpu.vector_store %arg5[%c0_41, %c0_42, %c0_43], %44 {strides = array<i32>} : memref<1x256x128xf32, #tpu.memory_space<vmem>>, vector<1x256x128xf32>,
    %cst_44 = arith.constant dense<0.000000e+00> : vector<128xf32>
    %45 = vector.multi_reduction <add>, %41, %cst_44 [0] : vector<256x128xf32> to vector<128xf32>
    %46 = vector.shape_cast %45 : vector<128xf32> to vector<1x128xf32>
    %c0_45 = arith.constant 0 : index
    %c0_46 = arith.constant 0 : index
    %c0_47 = arith.constant 0 : index
    %c0_48 = arith.constant 0 : index
    %47 = vector.load %arg6[%c0_45, %c0_46, %c0_47, %c0_48] : memref<1x1x2x128xf32, #tpu.memory_space<vmem>>, vector<1x1x1x128xf32>
    %48 = vector.shape_cast %47 : vector<1x1x1x128xf32> to vector<1x128xf32>
    %49 = vector.shape_cast %46 : vector<1x128xf32> to vector<1x1x1x128xf32>
    tpu.vector_store %arg6[%c0_45, %c0_46, %c0_47, %c0_48], %49 {strides = array<i32>} : memref<1x1x2x128xf32, #tpu.memory_space<vmem>>, vector<1x1x1x128xf32>,
    %50 = arith.mulf %41, %41 : vector<256x128xf32>
    %cst_49 = arith.constant dense<0.000000e+00> : vector<128xf32>
    %51 = vector.multi_reduction <add>, %50, %cst_49 [0] : vector<256x128xf32> to vector<128xf32>
    %52 = vector.shape_cast %51 : vector<128xf32> to vector<1x128xf32>
    %c0_50 = arith.constant 0 : index
    %c0_51 = arith.constant 0 : index
    %c1_52 = arith.constant 1 : index
    %c0_53 = arith.constant 0 : index
    %53 = vector.load %arg6[%c0_50, %c0_51, %c1_52, %c0_53] : memref<1x1x2x128xf32, #tpu.memory_space<vmem>>, vector<1x1x1x128xf32>
    %54 = vector.shape_cast %53 : vector<1x1x1x128xf32> to vector<1x128xf32>
    %55 = vector.shape_cast %52 : vector<1x128xf32> to vector<1x1x1x128xf32>
    tpu.vector_store %arg6[%c0_50, %c0_51, %c1_52, %c0_53], %55 {strides = array<i32>} : memref<1x1x2x128xf32, #tpu.memory_space<vmem>>, vector<1x1x1x128xf32>,
    return
  }
  func.func @transform_0(%arg0: i32, %arg1: i32, %arg2: i32) -> (i32, i32, i32, i32, i32) {
    %c0_i32 = arith.constant 0 : i32
    %c0_i32_0 = arith.constant 0 : i32
    %c0_i32_1 = arith.constant 0 : i32
    %c0_i32_2 = arith.constant 0 : i32
    %c0_i32_3 = arith.constant 0 : i32
    return %arg0, %c0_i32, %c0_i32_0, %c0_i32_1, %c0_i32_2 : i32, i32, i32, i32, i32
  }
  func.func @transform_1(%arg0: i32, %arg1: i32, %arg2: i32) -> (i32, i32) {
    %c0_i32 = arith.constant 0 : i32
    %c0_i32_0 = arith.constant 0 : i32
    return %c0_i32, %arg2 : i32, i32
  }
  func.func @transform_2(%arg0: i32, %arg1: i32, %arg2: i32) -> (i32, i32, i32) {
    %c0_i32 = arith.constant 0 : i32
    return %arg0, %arg1, %arg2 : i32, i32, i32
  }
  func.func @transform_3(%arg0: i32, %arg1: i32, %arg2: i32) -> (i32, i32, i32, i32) {
    %c0_i32 = arith.constant 0 : i32
    %c0_i32_0 = arith.constant 0 : i32
    return %arg0, %arg1, %c0_i32, %arg2 : i32, i32, i32, i32
  }
}

</mosaic_0001>

<bundles_post_ra>
// kernel: tpu_custom_call.1
= control target key start
LH: loop header
LB: loop body
LE: loop exit
PB: predicated region body
PF: predicated region fallthrough
CT: control target
= control target key end

     0   :  { %9 = vsyncpa [#allocation3], 0  ;;  %s4411_s0 = inlined_call_operand.vmem [shape: f32[2,1,18,18,4], index: 0, kind: input, shape index: {}]   ;;  %s4412_s1 = inlined_call_operand.vmem [shape: f32[36,128], index: 1, kind: input, shape index: {}]   ;;  %s4413_s2 = inlined_call_operand.hbm [shape: f32[2,256,128], index: 2, kind: output, shape index: {0}]   ;;  %s4414_s3 = inlined_call_operand.hbm [shape: f32[2,1,2,128], index: 3, kind: output, shape index: {1}]  }
   0x1   :  { %11 = vsyncpa [#allocation3 + $0x1], 0 }
   0x2   :  { %12 = vsyncpa [#allocation5], 0 }
   0x3   :  { %14 = vsyncpa [#allocation5 + $0x1], 0  ;;  %s3010_s12 = smov 0   ;;  %s3012_s13 = smov 0  }
   0x4   :  { %s3014_s14 = smov 0   ;;  %s3016_s15 = smov 0  }
   0x5   :  { %s3018_s16 = smov 0   ;;  %s3020_s17 = smov 0  }
   0x6 LB: > { %s2454_s18 = sadd.s32 4294967295, %s2977_s17   ;;  %s2455_s19 = sadd.s32 4294967294, %s2977_s17   ;;  %s2977_s17 = sphi %s3020_s17, %s20_s17   ;;  %s2973_s16 = sphi %s3018_s16, %s4543_s16   ;;  %s2969_s15 = sphi %s3016_s15, %s4542_s15   ;;  %s2965_s14 = sphi %s3014_s14, %s4541_s14   ;;  %s2961_s13 = sphi %s3012_s13, %s4540_s13   ;;  %s2957_s12 = sphi %s3010_s12, %s4539_s12  }
   0x7   : > { %s39_s20 = sadd.s32 1, %s2973_s16  ;;  %s102_s21 = sadd.s32 1, %s2965_s14 }
   0x8   : > { %p41_p0 = scmp.ge.s32.totalorder %s39_s20, 2  ;;  %p112_p1 = scmp.ne.s32.totalorder %s2965_s14, %s2961_s13 }
   0x9   : > { %p113_p2 = scmp.eq.s32.totalorder %s2454_s18, 1  ;;  %p118_p3 = scmp.ne.s32.totalorder %s2961_s13, %s2957_s12 }
   0xa   : > { %s4545_s20 = smov (%p41_p0, %s39_s20), 0  ;;  %p119_p5 = scmp.eq.s32.totalorder %s2455_s19, 1 }
   0xb   : > { %p3050_p4 = por %p113_p2, %p112_p1  ;;  %s95_s23 = ssub.s32 %s2973_s16, %s4545_s20 }
   0xc   : > { %p2459_p6 = scmp.ge.s32.totalorder %s2977_s17, 1  ;;  %p100_p7 = scmp.eq.s32.totalorder %s95_s23, 0 }
   0xd   : > { %p3057_p8 = por %p119_p5, %p118_p3  ;;  %p182_p9 = scmp.lt.s32.totalorder %s2977_s17, 3 }
   0xe   : > { %s3063_s25 = scalar_select %p100_p7, %s2965_s14, %s102_s21  }
   0xf   : > { %p183_p10 = pnand %p2459_p6, %p182_p9 }
  0x11   : > { %186 = sbr.rel (%p183_p10) target bundleno = 891 (0x37b), region = 28 }
  0x16   : > { %p215_p11 = scmp.lt.s32.totalorder %s2969_s15, 1  ;;  %s2979_s4 = smov 4   ;;  %vm1912_vm0 = vcmask 1043456   ;;  %vm1546_vm1 = vcmask 31744   ;;  %vm1579_vm2 = vcmask 64512   ;;  %vm1612_vm3 = vcmask 97280  }
  0x17   : > { %s2980_s5 = smov 8   ;;  %s2981_s6 = smov 12   ;;  %vm1645_vm4 = vcmask 130048   ;;  %vm1678_vm5 = vcmask 162816   ;;  %vm1711_vm6 = vcmask 195584   ;;  %vm1744_vm7 = vcmask 228352  }
  0x18   : > { %s216_s26 = scalar_select %p215_p11, %s2969_s15, 1  ;;  %vm1777_vm8 = vcmask 261120   ;;  %vm1815_vm9 = vcmask 293888  }
  0x19   : > { %s2982_s7 = smov 16   ;;  %s2983_s18 = smov 20  }
  0x1a   : > { %s2801_s27 = smul.u32 432, %s216_s26  ;;  %s2986_s8 = smov 32  }
  0x1b   : > { %s2987_s26 = smov [#allocation2]  }
  0x1c   : > { %s3070_s30 = scalar_lea.vmem %s4411_s0, %s2801_s27  ;;  %s2984_s27 = smov 24  }
  0x1d   : > { %v3073_v0 = vld [vmem:[%s3070_s30 + $0x19] sm:$0xff]  ;;  %v260_v1 = vld [vmem:[%s3070_s30 + $0x1] sm:$0xff]  ;;  %v261_v3 = vld [vmem:[%s3070_s30 + $0x9] sm:$0xff] }
  0x1e   : > { %558 = vrot.lane.b32.xlu1 %v3073_v0, %s2979_s4  ;;  %554 = vrot.lane.b32.xlu0 %v260_v1, %s2979_s4  ;;  %v3080_v2 = vld [vmem:[%s3070_s30 + $0x21] sm:$0xff]  ;;  %v3087_v4 = vld [vmem:[%s3070_s30 + $0x39] sm:$0xff] }
  0x1f   : > { %v3090_v5 = vld [vmem:[%s3070_s30 + $0x31] sm:$0xff]  ;;  %v3100_v7 = vld [vmem:[%s3070_s30 + $0x49] sm:$0xff]  ;;  %v3110_v9 = vld [vmem:[%s3070_s30 + $0x61] sm:$0xff] }
  0x20   : > { %v3097_v6 = vld [vmem:[%s3070_s30 + $0x51] sm:$0xff]  ;;  %v3107_v8 = vld [vmem:[%s3070_s30 + $0x69] sm:$0xff]  ;;  %v3117_v10 = vld [vmem:[%s3070_s30 + $0x81] sm:$0xff] }
  0x21   : > { %4449 = vst [vmem:[#allocation8_spill] sm:$0xff] %v3117_v10  ;;  %v3120_v11 = vld [vmem:[%s3070_s30 + $0x79] sm:$0xff]  ;;  %v3130_v13 = vld [vmem:[%s3070_s30 + $0x91] sm:$0xff]  ;;  %v3140_v15 = vld [vmem:[%s3070_s30 + $0xa9] sm:$0xff] }
  0x22   : > { %560 = vrot.lane.b32.xlu1 %v3080_v2, %s2979_s4  ;;  %556 = vrot.lane.b32.xlu0 %v261_v3, %s2979_s4  ;;  %4450 = vst [vmem:[#allocation9_spill] sm:$0xff] %v3120_v11  ;;  %v3127_v12 = vld [vmem:[%s3070_s30 + $0x99] sm:$0xff]  ;;  %4452 = vst [vmem:[#allocation11_spill] sm:$0xff] %v3130_v13  ;;  %v3137_v14 = vld [vmem:[%s3070_s30 + $0xb1] sm:$0xff] }
  0x23   : > { %4451 = vst [vmem:[#allocation10_spill] sm:$0xff] %v3127_v12  ;;  %4453 = vst [vmem:[#allocation12_spill] sm:$0xff] %v3137_v14  ;;  %v277_v16 = vld [vmem:[%s3070_s30 + $0xc9] sm:$0xff]  ;;  %v276_v17 = vld [vmem:[%s3070_s30 + $0xc1] sm:$0xff] }
  0x24   : > { %4454 = vst [vmem:[#allocation13_spill] sm:$0xff] %v3140_v15  ;;  %v279_v18 = vld [vmem:[%s3070_s30 + $0xe1] sm:$0xff]  ;;  %v278_v19 = vld [vmem:[%s3070_s30 + $0xd9] sm:$0xff]  ;;  %v280_v21 = vld [vmem:[%s3070_s30 + $0xf1] sm:$0xff] }
  0x25   : > { %v281_v20 = vld [vmem:[%s3070_s30 + $0xf9] sm:$0xff]  ;;  %v283_v22 = vld [vmem:[%s3070_s30 + $0x111] sm:$0xff]  ;;  %v282_v23 = vld [vmem:[%s3070_s30 + $0x109] sm:$0xff] }
  0x26   : > { %564 = vrot.lane.b32.xlu1 %v3087_v4, %s2979_s4  ;;  %562 = vrot.lane.b32.xlu0 %v3090_v5, %s2979_s4  ;;  %v285_v24 = vld [vmem:[%s3070_s30 + $0x129] sm:$0xff]  ;;  %v284_v25 = vld [vmem:[%s3070_s30 + $0x121] sm:$0xff] }
  0x27   : > { %v287_v26 = vld [vmem:[%s3070_s30 + $0x141] sm:$0xff]  ;;  %v286_v27 = vld [vmem:[%s3070_s30 + $0x139] sm:$0xff]  ;;  %v288_v29 = vld [vmem:[%s3070_s30 + $0x151] sm:$0xff] }
  0x28   : > { %v289_v28 = vld [vmem:[%s3070_s30 + $0x159] sm:$0xff]  ;;  %v291_v30 = vld [vmem:[%s3070_s30 + $0x171] sm:$0xff]  ;;  %v290_v31 = vld [vmem:[%s3070_s30 + $0x169] sm:$0xff] }
  0x29   : > { %v293_v32 = vld [vmem:[%s3070_s30 + $0xa] sm:$0xff]  ;;  %v292_v33 = vld [vmem:[%s3070_s30 + $0x2] sm:$0xff]  ;;  %v3186_v35 = vld [vmem:[%s3070_s30 + $0x1a] sm:$0xff] }
  0x2a   : > { %568 = vrot.lane.b32.xlu1 %v3097_v6, %s2979_s4  ;;  %566 = vrot.lane.b32.xlu0 %v3100_v7, %s2979_s4  ;;  %v3183_v34 = vld [vmem:[%s3070_s30 + $0x22] sm:$0xff]  ;;  %v3193_v36 = vld [vmem:[%s3070_s30 + $0x3a] sm:$0xff] }
  0x2b   : > { %v3196_v37 = vld [vmem:[%s3070_s30 + $0x32] sm:$0xff]  ;;  %v3206_v39 = vld [vmem:[%s3070_s30 + $0x4a] sm:$0xff]  ;;  %v3216_v41 = vld [vmem:[%s3070_s30 + $0x62] sm:$0xff] }
  0x2c   : > { %v3203_v38 = vld [vmem:[%s3070_s30 + $0x52] sm:$0xff]  ;;  %v3213_v40 = vld [vmem:[%s3070_s30 + $0x6a] sm:$0xff]  ;;  %v3223_v42 = vld [vmem:[%s3070_s30 + $0x82] sm:$0xff] }
  0x2d   : > { %4455 = vst [vmem:[#allocation14_spill] sm:$0xff] %v3223_v42  ;;  %v3226_v43 = vld [vmem:[%s3070_s30 + $0x7a] sm:$0xff]  ;;  %v3236_v45 = vld [vmem:[%s3070_s30 + $0x92] sm:$0xff]  ;;  %v3246_v47 = vld [vmem:[%s3070_s30 + $0xaa] sm:$0xff] }
  0x2e   : > { %572 = vrot.lane.b32.xlu1 %v3107_v8, %s2979_s4  ;;  %570 = vrot.lane.b32.xlu0 %v3110_v9, %s2979_s4  ;;  %4456 = vst [vmem:[#allocation15_spill] sm:$0xff] %v3226_v43  ;;  %v3233_v44 = vld [vmem:[%s3070_s30 + $0x9a] sm:$0xff]  ;;  %4458 = vst [vmem:[#allocation17_spill] sm:$0xff] %v3236_v45  ;;  %v3243_v46 = vld [vmem:[%s3070_s30 + $0xb2] sm:$0xff] }
  0x2f   : > { %4457 = vst [vmem:[#allocation16_spill] sm:$0xff] %v3233_v44  ;;  %4459 = vst [vmem:[#allocation18_spill] sm:$0xff] %v3243_v46  ;;  %v3253_v48 = vld [vmem:[%s3070_s30 + $0xca] sm:$0xff]  ;;  %v3256_v49 = vld [vmem:[%s3070_s30 + $0xc2] sm:$0xff] }
  0x30   : > { %4460 = vst [vmem:[#allocation19_spill] sm:$0xff] %v3246_v47  ;;  %4461 = vst [vmem:[#allocation20_spill] sm:$0xff] %v3253_v48  ;;  %v311_v50 = vld [vmem:[%s3070_s30 + $0xe2] sm:$0xff]  ;;  %v310_v51 = vld [vmem:[%s3070_s30 + $0xda] sm:$0xff] }
  0x31   : > { %4462 = vst [vmem:[#allocation21_spill] sm:$0xff] %v3256_v49  ;;  %v313_v52 = vld [vmem:[%s3070_s30 + $0xfa] sm:$0xff]  ;;  %v312_v53 = vld [vmem:[%s3070_s30 + $0xf2] sm:$0xff]  ;;  %v314_v55 = vld [vmem:[%s3070_s30 + $0x10a] sm:$0xff] }
  0x32   : > { %576 = vrot.lane.b32.xlu1 %v3117_v10, %s2979_s4  ;;  %574 = vrot.lane.b32.xlu0 %v3120_v11, %s2979_s4  ;;  %v315_v54 = vld [vmem:[%s3070_s30 + $0x112] sm:$0xff]  ;;  %v317_v56 = vld [vmem:[%s3070_s30 + $0x12a] sm:$0xff] }
  0x33   : > { %v316_v57 = vld [vmem:[%s3070_s30 + $0x122] sm:$0xff]  ;;  %v318_v59 = vld [vmem:[%s3070_s30 + $0x13a] sm:$0xff]  ;;  %v320_v63 = vld [vmem:[%s3070_s30 + $0x152] sm:$0xff] }
  0x34   : > { %v319_v58 = vld [vmem:[%s3070_s30 + $0x142] sm:$0xff]  ;;  %v321_v62 = vld [vmem:[%s3070_s30 + $0x15a] sm:$0xff]  ;;  %v1812_v11 = vld [vmem:[%s4412_s1 + $0x10] sm:$0xff] }
  0x36   : > { %580 = vrot.lane.b32.xlu1 %v3127_v12, %s2979_s4  ;;  %578 = vrot.lane.b32.xlu0 %v3130_v13, %s2979_s4  ;;  %v3461_v13 = vld [vmem:[%s3070_s30 + $0x120] sm:$0xff] }
  0x3a   : > { %584 = vrot.lane.b32.xlu1 %v3137_v14, %s2979_s4  ;;  %582 = vrot.lane.b32.xlu0 %v3140_v15, %s2979_s4  ;;  %v3447_v15 = vld [vmem:[%s3070_s30 + $0x110] sm:$0xff] }
  0x3e   : > { %588 = vrot.lane.b32.xlu1 %v277_v16, %s2979_s4  ;;  %586 = vrot.lane.b32.xlu0 %v276_v17, %s2979_s4  ;;  %v323_v16 = vld [vmem:[%s3070_s30 + $0x172] sm:$0xff]  ;;  %v322_v17 = vld [vmem:[%s3070_s30 + $0x16a] sm:$0xff] }
  0x42   : > { %592 = vrot.lane.b32.xlu1 %v279_v18, %s2979_s4  ;;  %590 = vrot.lane.b32.xlu0 %v278_v19, %s2979_s4 }
  0x46   : > { %596 = vrot.lane.b32.xlu1 %v281_v20, %s2979_s4  ;;  %594 = vrot.lane.b32.xlu0 %v280_v21, %s2979_s4 }
  0x4a   : > { %600 = vrot.lane.b32.xlu1 %v283_v22, %s2979_s4  ;;  %598 = vrot.lane.b32.xlu0 %v282_v23, %s2979_s4  ;;  %v3307_v22 = vld [vmem:[%s3070_s30 + $0x18] sm:$0xff]  ;;  %v3310_v23 = vld [vmem:[%s3070_s30 + $0x20] sm:$0xff] }
  0x4b   : > { %4470 = vst [vmem:[#allocation29_spill] sm:$0xff] %v3307_v22  ;;  %4471 = vst [vmem:[#allocation30_spill] sm:$0xff] %v3310_v23 }
  0x4e   : > { %604 = vrot.lane.b32.xlu1 %v285_v24, %s2979_s4  ;;  %602 = vrot.lane.b32.xlu0 %v284_v25, %s2979_s4 }
  0x52   : > { %608 = vrot.lane.b32.xlu1 %v287_v26, %s2979_s4  ;;  %606 = vrot.lane.b32.xlu0 %v286_v27, %s2979_s4  ;;  %v3321_v26 = vld [vmem:[%s3070_s30 + $0x38] sm:$0xff]  ;;  %v3324_v27 = vld [vmem:[%s3070_s30 + $0x30] sm:$0xff] }
  0x53   : > { %4472 = vst [vmem:[#allocation31_spill] sm:$0xff] %v3321_v26  ;;  %4473 = vst [vmem:[#allocation32_spill] sm:$0xff] %v3324_v27 }
  0x56   : > { %612 = vrot.lane.b32.xlu1 %v289_v28, %s2979_s4  ;;  %610 = vrot.lane.b32.xlu0 %v288_v29, %s2979_s4 }
  0x5a   : > { %616 = vrot.lane.b32.xlu1 %v291_v30, %s2979_s4  ;;  %614 = vrot.lane.b32.xlu0 %v290_v31, %s2979_s4  ;;  %v3335_v30 = vld [vmem:[%s3070_s30 + $0x50] sm:$0xff]  ;;  %v3338_v31 = vld [vmem:[%s3070_s30 + $0x48] sm:$0xff]  ;;  %s2985_s4 = smov 28  }
  0x5e   : > { %684 = vrot.lane.b32.xlu1 %v293_v32, %s2980_s5  ;;  %682 = vrot.lane.b32.xlu0 %v292_v33, %s2980_s5 }
  0x62   : > { %688 = vrot.lane.b32.xlu1 %v3183_v34, %s2980_s5  ;;  %686 = vrot.lane.b32.xlu0 %v3186_v35, %s2980_s5 }
  0x66   : > { %692 = vrot.lane.b32.xlu1 %v3193_v36, %s2980_s5  ;;  %690 = vrot.lane.b32.xlu0 %v3196_v37, %s2980_s5 }
  0x6a   : > { %696 = vrot.lane.b32.xlu1 %v3203_v38, %s2980_s5  ;;  %694 = vrot.lane.b32.xlu0 %v3206_v39, %s2980_s5 }
  0x6e   : > { %700 = vrot.lane.b32.xlu1 %v3213_v40, %s2980_s5  ;;  %698 = vrot.lane.b32.xlu0 %v3216_v41, %s2980_s5 }
  0x72   : > { %704 = vrot.lane.b32.xlu1 %v3223_v42, %s2980_s5  ;;  %702 = vrot.lane.b32.xlu0 %v3226_v43, %s2980_s5  ;;  %v1814_v42 = vld [vmem:[%s4412_s1 + $0x20] sm:$0xf] }
  0x73   : > { %2733 = vmatprep.subr.msk.mxu0 %vm1912_vm0, %v1814_v42  ;;  %2791 = vmatprep.subr.msk.mxu1 %vm1912_vm0, %v1814_v42 }
  0x74   : > { %2734 = vmatpush3.msk.msra.mxu0 %vm1912_vm0, %v1814_v42  ;;  %2796 = vmatpush3.msk.msra.mxu1 %vm1912_vm0, %v1814_v42 }
  0x76   : > { %708 = vrot.lane.b32.xlu1 %v3233_v44, %s2980_s5  ;;  %706 = vrot.lane.b32.xlu0 %v3236_v45, %s2980_s5  ;;  %v3450_v44 = vld [vmem:[%s3070_s30 + $0x108] sm:$0xff] }
  0x7a   : > { %712 = vrot.lane.b32.xlu1 %v3243_v46, %s2980_s5  ;;  %710 = vrot.lane.b32.xlu0 %v3246_v47, %s2980_s5  ;;  %v3436_v46 = vld [vmem:[%s3070_s30 + $0xf0] sm:$0xff] }
  0x7e   : > { %716 = vrot.lane.b32.xlu1 %v3253_v48, %s2980_s5  ;;  %714 = vrot.lane.b32.xlu0 %v3256_v49, %s2980_s5  ;;  %v3422_v48 = vld [vmem:[%s3070_s30 + $0xd8] sm:$0xff] }
  0x82   : > { %720 = vrot.lane.b32.xlu1 %v311_v50, %s2980_s5  ;;  %718 = vrot.lane.b32.xlu0 %v310_v51, %s2980_s5  ;;  %v3349_v50 = vld [vmem:[%s3070_s30 + $0x68] sm:$0xff]  ;;  %v3352_v51 = vld [vmem:[%s3070_s30 + $0x60] sm:$0xff] }
  0x86   : > { %724 = vrot.lane.b32.xlu1 %v313_v52, %s2980_s5  ;;  %722 = vrot.lane.b32.xlu0 %v312_v53, %s2980_s5 }
  0x8a   : > { %728 = vrot.lane.b32.xlu1 %v315_v54, %s2980_s5  ;;  %726 = vrot.lane.b32.xlu0 %v314_v55, %s2980_s5  ;;  %v3363_v54 = vld [vmem:[%s3070_s30 + $0x80] sm:$0xff]  ;;  %v3366_v55 = vld [vmem:[%s3070_s30 + $0x78] sm:$0xff] }
  0x8e   : > { %732 = vrot.lane.b32.xlu1 %v317_v56, %s2980_s5  ;;  %730 = vrot.lane.b32.xlu0 %v316_v57, %s2980_s5 }
  0x90   : > { %v3280_v60 = vpop.permute.xlu1 %558  ;;  %v3282_v61 = vpop.permute.xlu0 %554 }
  0x91   : > { %4463 = vst [vmem:[#allocation22_spill] sm:$0xff] %v3280_v60  ;;  %4464 = vst [vmem:[#allocation23_spill] sm:$0xff] %v3282_v61  ;;  %v3419_v60 = vld [vmem:[%s3070_s30 + $0xe0] sm:$0xff]  ;;  %v3433_v61 = vld [vmem:[%s3070_s30 + $0xf8] sm:$0xff] }
  0x92   : > { %736 = vrot.lane.b32.xlu1 %v319_v58, %s2980_s5  ;;  %734 = vrot.lane.b32.xlu0 %v318_v59, %s2980_s5  ;;  %v3377_v58 = vld [vmem:[%s3070_s30 + $0x98] sm:$0xff]  ;;  %v3380_v59 = vld [vmem:[%s3070_s30 + $0x90] sm:$0xff] }
  0x94   : > { %v3288_v1 = vpop.permute.xlu1 %560  ;;  %v3290_v3 = vpop.permute.xlu0 %556 }
  0x95   : > { %4465 = vst [vmem:[#allocation24_spill] sm:$0xff] %v3288_v1  ;;  %4466 = vst [vmem:[#allocation25_spill] sm:$0xff] %v3290_v3 }
  0x96   : > { %740 = vrot.lane.b32.xlu1 %v321_v62, %s2980_s5  ;;  %738 = vrot.lane.b32.xlu0 %v320_v63, %s2980_s5 }
  0x98   : > { %v3296_v18 = vpop.permute.xlu1 %564  ;;  %v3298_v19 = vpop.permute.xlu0 %562 }
  0x99   : > { %4467 = vst [vmem:[#allocation26_spill] sm:$0xff] %v3296_v18  ;;  %4468 = vst [vmem:[#allocation27_spill] sm:$0xff] %v3298_v19  ;;  %v3405_v19 = vld [vmem:[%s3070_s30 + $0xc8] sm:$0xff] }
  0x9a   : > { %744 = vrot.lane.b32.xlu1 %v323_v16, %s2980_s5  ;;  %742 = vrot.lane.b32.xlu0 %v322_v17, %s2980_s5  ;;  %v3391_v16 = vld [vmem:[%s3070_s30 + $0xb0] sm:$0xff]  ;;  %v3394_v17 = vld [vmem:[%s3070_s30 + $0xa8] sm:$0xff] }
  0x9c   : > { %v3302_v20 = vpop.permute.xlu1 %568  ;;  %v3304_v21 = vpop.permute.xlu0 %566 }
  0x9d   : > { %4469 = vst [vmem:[#allocation28_spill] sm:$0xff] %v3304_v21 }
  0x9e   : > { %812 = vrot.lane.b32.xlu1 %v3310_v23, %s2981_s6  ;;  %810 = vrot.lane.b32.xlu0 %v3307_v22, %s2981_s6  ;;  %v3408_v23 = vld [vmem:[%s3070_s30 + $0xc0] sm:$0xff] }
  0xa0   : > { %v3316_v24 = vpop.permute.xlu1 %572  ;;  %v3318_v25 = vpop.permute.xlu0 %570 }
  0xa2   : > { %816 = vrot.lane.b32.xlu1 %v3321_v26, %s2981_s6  ;;  %814 = vrot.lane.b32.xlu0 %v3324_v27, %s2981_s6 }
  0xa4   : > { %v3330_v28 = vpop.permute.xlu1 %576  ;;  %v3332_v29 = vpop.permute.xlu0 %574 }
  0xa6   : > { %820 = vrot.lane.b32.xlu1 %v3335_v30, %s2981_s6  ;;  %818 = vrot.lane.b32.xlu0 %v3338_v31, %s2981_s6 }
  0xa8   : > { %v3344_v32 = vpop.permute.xlu1 %580  ;;  %v3346_v33 = vpop.permute.xlu0 %578 }
  0xaa   : > { %824 = vrot.lane.b32.xlu1 %v3349_v50, %s2981_s6  ;;  %822 = vrot.lane.b32.xlu0 %v3352_v51, %s2981_s6 }
  0xac   : > { %v3358_v52 = vpop.permute.xlu1 %584  ;;  %v3360_v53 = vpop.permute.xlu0 %582 }
  0xae   : > { %828 = vrot.lane.b32.xlu1 %v3363_v54, %s2981_s6  ;;  %826 = vrot.lane.b32.xlu0 %v3366_v55, %s2981_s6 }
  0xb0   : > { %v3372_v56 = vpop.permute.xlu1 %588  ;;  %v3374_v57 = vpop.permute.xlu0 %586 }
  0xb2   : > { %832 = vrot.lane.b32.xlu1 %v3377_v58, %s2981_s6  ;;  %830 = vrot.lane.b32.xlu0 %v3380_v59, %s2981_s6 }
  0xb4   : > { %v3386_v62 = vpop.permute.xlu1 %592  ;;  %v3388_v63 = vpop.permute.xlu0 %590 }
  0xb6   : > { %836 = vrot.lane.b32.xlu1 %v3391_v16, %s2981_s6  ;;  %834 = vrot.lane.b32.xlu0 %v3394_v17, %s2981_s6 }
  0xb8   : > { %v3400_v21 = vpop.permute.xlu1 %596  ;;  %v3402_v18 = vpop.permute.xlu0 %594 }
  0xba   : > { %840 = vrot.lane.b32.xlu1 %v3405_v19, %s2981_s6  ;;  %838 = vrot.lane.b32.xlu0 %v3408_v23, %s2981_s6 }
  0xbc   : > { %v3414_v1 = vpop.permute.xlu1 %600  ;;  %v3416_v22 = vpop.permute.xlu0 %598 }
  0xbe   : > { %844 = vrot.lane.b32.xlu1 %v3419_v60, %s2981_s6  ;;  %842 = vrot.lane.b32.xlu0 %v3422_v48, %s2981_s6 }
  0xc0   : > { %v3428_v49 = vpop.permute.xlu1 %604  ;;  %v3430_v3 = vpop.permute.xlu0 %602 }
  0xc2   : > { %848 = vrot.lane.b32.xlu1 %v3433_v61, %s2981_s6  ;;  %846 = vrot.lane.b32.xlu0 %v3436_v46, %s2981_s6 }
  0xc4   : > { %v3442_v47 = vpop.permute.xlu1 %608  ;;  %v3444_v14 = vpop.permute.xlu0 %606 }
  0xc6   : > { %852 = vrot.lane.b32.xlu1 %v3447_v15, %s2981_s6  ;;  %850 = vrot.lane.b32.xlu0 %v3450_v44, %s2981_s6 }
  0xc8   : > { %v3456_v45 = vpop.permute.xlu1 %612  ;;  %v3458_v12 = vpop.permute.xlu0 %610 }
  0xca   : > { %938 = vrot.lane.b32.xlu1 %v3073_v0, %s2982_s7  ;;  %854 = vrot.lane.b32.xlu0 %v3461_v13, %s2981_s6  ;;  %v1813_v0 = vld [vmem:[%s4412_s1 + $0x18] sm:$0xff] }
  0xcb   : > { %2735 = vmatprep.subr.mxu0 %v1813_v0  ;;  %2792 = vmatprep.subr.mxu1 %v1813_v0 }
  0xcc   : > { %v3470_v43 = vpop.permute.xlu1 %616  ;;  %v3472_v10 = vpop.permute.xlu0 %614  ;;  %2736 = vmatpush3.msra.mxu0 %v1813_v0  ;;  %2797 = vmatpush3.msra.mxu1 %v1813_v0  ;;  %v1810_v0 = vld [vmem:[%s4412_s1] sm:$0xff] }
  0xcd   : > { %4474 = vst [vmem:[#allocation33_spill] sm:$0xff] %v3472_v10  ;;  %2737 = vmatprep.subr.mxu0 %v1812_v11  ;;  %2793 = vmatprep.subr.mxu1 %v1812_v11 }
  0xce   : > { %1066 = vrot.lane.b32.xlu1 %v3186_v35, %s2983_s18  ;;  %940 = vrot.lane.b32.xlu0 %v3080_v2, %s2982_s7  ;;  %v1811_v35 = vld [vmem:[%s4412_s1 + $0x8] sm:$0xff] }
  0xcf   : > { %2738 = vmatpush3.msra.mxu0 %v1812_v11  ;;  %2798 = vmatpush3.msra.mxu1 %v1812_v11 }
  0xd0   : > { %v3484_v10 = vpop.permute.xlu1 %684  ;;  %v3486_v42 = vpop.permute.xlu0 %682  ;;  %2739 = vmatprep.subr.mxu0 %v1811_v35  ;;  %2794 = vmatprep.subr.mxu1 %v1811_v35 }
  0xd1   : > { %4475 = vst [vmem:[#allocation34_spill] sm:$0xff] %v3484_v10  ;;  %2740 = vmatpush3.msra.mxu0 %v1811_v35  ;;  %2799 = vmatpush3.msra.mxu1 %v1811_v35  ;;  %v1554_v35 = vsel %vm1546_vm1, %v3335_v30, %v3302_v20  ;;  %v1555_v20 = vsel %vm1546_vm1, %v3352_v51, %v3318_v25 }
  0xd2   : > { %1194 = vrot.lane.b32.xlu1 %v3324_v27, %s2984_s27  ;;  %1068 = vrot.lane.b32.xlu0 %v3183_v34, %s2983_s18 }
  0xd3   : > { %2741 = vmatprep.subr.mxu0 %v1810_v0  ;;  %2795 = vmatprep.subr.mxu1 %v1810_v0 }
  0xd4   : > { %v3495_v2 = vpop.permute.xlu1 %688  ;;  %v3497_v10 = vpop.permute.xlu0 %686  ;;  %2742 = vmatpush3.msra.mxu0 %v1810_v0  ;;  %2800 = vmatpush3.msra.mxu1 %v1810_v0 }
  0xd6   : > { %1322 = vrot.lane.b32.xlu1 %v3090_v5, %s2985_s4  ;;  %1196 = vrot.lane.b32.xlu0 %v3321_v26, %s2984_s27 }
  0xd8   : > { %v3506_v11 = vpop.permute.xlu1 %692  ;;  %v3508_v34 = vpop.permute.xlu0 %690 }
  0xd9   : > { %4476 = vst [vmem:[#allocation35_spill] sm:$0xff] %v3506_v11 }
  0xda   : > { %1324 = vrot.lane.b32.xlu1 %v3087_v4, %s2985_s4  ;;  %942 = vrot.lane.b32.xlu0 %v3090_v5, %s2982_s7  ;;  %v1556_v5 = vsel %vm1546_vm1, %v3349_v50, %v3316_v24  ;;  %v1557_v24 = vsel %vm1546_vm1, %v3366_v55, %v3332_v29 }
  0xdc   : > { %v697_v26 = vpop.permute.xlu1 %696  ;;  %v3517_v27 = vpop.permute.xlu0 %694 }
  0xdd   : > { %4477 = vst [vmem:[#allocation36_spill] sm:$0xff] %v3517_v27  ;;  %v3520_v11 = vsel %vm1579_vm2, %v1554_v35, %v697_v26 }
  0xde   : > { %944 = vrot.lane.b32.xlu1 %v3087_v4, %s2982_s7  ;;  %1450 = vrot.lane.b32.xlu0 %v3196_v37, %s2986_s8  ;;  %v1558_v4 = vsel %vm1546_vm1, %v3363_v54, %v3330_v28  ;;  %v1559_v28 = vsel %vm1546_vm1, %v3380_v59, %v3346_v33 }
  0xe0   : > { %v701_v0 = vpop.permute.xlu1 %700  ;;  %v699_v27 = vpop.permute.xlu0 %698 }
  0xe1   : > { %v3533_v26 = vsel %vm1579_vm2, %v1556_v5, %v701_v0  ;;  %v3536_v35 = vsel %vm1579_vm2, %v1555_v20, %v699_v27 }
  0xe2   : > { %1452 = vrot.lane.b32.xlu1 %v3193_v36, %s2986_s8  ;;  %1070 = vrot.lane.b32.xlu0 %v3196_v37, %s2983_s18  ;;  %v1560_v37 = vsel %vm1546_vm1, %v3377_v58, %v3344_v32  ;;  %v1561_v32 = vsel %vm1546_vm1, %v3394_v17, %v3360_v53 }
  0xe4   : > { %v705_v25 = vpop.permute.xlu1 %704  ;;  %v703_v5 = vpop.permute.xlu0 %702 }
  0xe5   : > { %v3549_v0 = vsel %vm1579_vm2, %v1558_v4, %v705_v25  ;;  %v3552_v27 = vsel %vm1579_vm2, %v1557_v24, %v703_v5 }
  0xe6   : > { %1198 = vrot.lane.b32.xlu1 %v3338_v31, %s2984_s27  ;;  %1072 = vrot.lane.b32.xlu0 %v3193_v36, %s2983_s18  ;;  %v1562_v36 = vsel %vm1546_vm1, %v3391_v16, %v3358_v52  ;;  %v1563_v52 = vsel %vm1546_vm1, %v3408_v23, %v3374_v57 }
  0xe8   : > { %v709_v29 = vpop.permute.xlu1 %708  ;;  %v707_v20 = vpop.permute.xlu0 %706 }
  0xe9   : > { %v3565_v4 = vsel %vm1579_vm2, %v1560_v37, %v709_v29  ;;  %v3568_v24 = vsel %vm1579_vm2, %v1559_v28, %v707_v20 }
  0xea   : > { %1326 = vrot.lane.b32.xlu1 %v3100_v7, %s2985_s4  ;;  %1200 = vrot.lane.b32.xlu0 %v3335_v30, %s2984_s27  ;;  %v1564_v30 = vsel %vm1546_vm1, %v3405_v19, %v3372_v56  ;;  %v1565_v56 = vsel %vm1546_vm1, %v3422_v48, %v3388_v63 }
  0xec   : > { %v713_v33 = vpop.permute.xlu1 %712  ;;  %v711_v25 = vpop.permute.xlu0 %710 }
  0xed   : > { %v3581_v5 = vsel %vm1579_vm2, %v1562_v36, %v713_v33  ;;  %v3584_v37 = vsel %vm1579_vm2, %v1561_v32, %v711_v25 }
  0xee   : > { %1328 = vrot.lane.b32.xlu1 %v3097_v6, %s2985_s4  ;;  %946 = vrot.lane.b32.xlu0 %v3100_v7, %s2982_s7  ;;  %v1566_v7 = vsel %vm1546_vm1, %v3419_v60, %v3386_v62  ;;  %v1567_v62 = vsel %vm1546_vm1, %v3436_v46, %v3402_v18  ;;  %v1569_v18 = vsel %vm1546_vm1, %v3450_v44, %v3416_v22 }
  0xf0   : > { %v717_v53 = vpop.permute.xlu1 %716  ;;  %v715_v28 = vpop.permute.xlu0 %714 }
  0xf1   : > { %v3597_v29 = vsel %vm1579_vm2, %v1564_v30, %v717_v53  ;;  %v3600_v20 = vsel %vm1579_vm2, %v1563_v52, %v715_v28  ;;  %v3645_v28 = vld [vmem:[%s3070_s30 + $0x128] sm:$0xff] }
  0xf2   : > { %948 = vrot.lane.b32.xlu1 %v3097_v6, %s2982_s7  ;;  %1454 = vrot.lane.b32.xlu0 %v3206_v39, %s2986_s8  ;;  %v1568_v6 = vsel %vm1546_vm1, %v3433_v61, %v3400_v21 }
  0xf4   : > { %v721_v57 = vpop.permute.xlu1 %720  ;;  %v719_v36 = vpop.permute.xlu0 %718 }
  0xf5   : > { %v3613_v32 = vsel %vm1579_vm2, %v1566_v7, %v721_v57  ;;  %v3616_v33 = vsel %vm1579_vm2, %v1565_v56, %v719_v36  ;;  %v255_v57 = vld [vmem:[%s3070_s30 + $0x140] sm:$0xff]  ;;  %v254_v36 = vld [vmem:[%s3070_s30 + $0x138] sm:$0xff] }
  0xf6   : > { %4478 = vst [vmem:[#allocation37_spill] sm:$0xff] %v3613_v32  ;;  %1456 = vrot.lane.b32.xlu1 %v3203_v38, %s2986_s8  ;;  %1074 = vrot.lane.b32.xlu0 %v3206_v39, %s2983_s18  ;;  %v1570_v39 = vsel %vm1546_vm1, %v3447_v15, %v3414_v1  ;;  %v1571_v1 = vsel %vm1546_vm1, %v3461_v13, %v3430_v3 }
  0xf7   : > { %v1573_v3 = vsel %vm1546_vm1, %v254_v36, %v3444_v14 }
  0xf8   : > { %v725_v63 = vpop.permute.xlu1 %724  ;;  %v723_v25 = vpop.permute.xlu0 %722 }
  0xf9   : > { %v3629_v30 = vsel %vm1579_vm2, %v1568_v6, %v725_v63  ;;  %v3632_v52 = vsel %vm1579_vm2, %v1567_v62, %v723_v25  ;;  %v257_v25 = vld [vmem:[%s3070_s30 + $0x158] sm:$0xff] }
  0xfa   : > { %4479 = vst [vmem:[#allocation38_spill] sm:$0xff] %v3629_v30  ;;  %4480 = vst [vmem:[#allocation39_spill] sm:$0xff] %v3632_v52  ;;  %1202 = vrot.lane.b32.xlu1 %v3352_v51, %s2984_s27  ;;  %1076 = vrot.lane.b32.xlu0 %v3203_v38, %s2983_s18  ;;  %v1572_v38 = vsel %vm1546_vm1, %v3645_v28, %v3428_v49  ;;  %v1574_v49 = vsel %vm1546_vm1, %v255_v57, %v3442_v47 }
  0xfc   : > { %v729_v21 = vpop.permute.xlu1 %728  ;;  %v727_v53 = vpop.permute.xlu0 %726 }
  0xfd   : > { %v3648_v7 = vsel %vm1579_vm2, %v1570_v39, %v729_v21  ;;  %v3651_v51 = vsel %vm1579_vm2, %v1569_v18, %v727_v53  ;;  %v256_v39 = vld [vmem:[%s3070_s30 + $0x150] sm:$0xff] }
  0xfe   : > { %4481 = vst [vmem:[#allocation40_spill] sm:$0xff] %v3648_v7  ;;  %4482 = vst [vmem:[#allocation41_spill] sm:$0xff] %v3651_v51  ;;  %1330 = vrot.lane.b32.xlu1 %v3110_v9, %s2985_s4  ;;  %1204 = vrot.lane.b32.xlu0 %v3349_v50, %s2984_s27  ;;  %v1575_v14 = vsel %vm1546_vm1, %v256_v39, %v3458_v12  ;;  %v4489_v12 = vld [vmem:[#allocation33_spill] sm:$0xff]  ;;  %v4493_v39 = vld [vmem:[#allocation8_spill] sm:$0xff] }
  0xff   : > { %v228_v7 = vld [vmem:[%s3070_s30] sm:$0xff] }
 0x100   : > { %v733_v22 = vpop.permute.xlu1 %732  ;;  %v731_v56 = vpop.permute.xlu0 %730 }
 0x101   : > { %v3666_v6 = vsel %vm1579_vm2, %v1572_v38, %v733_v22  ;;  %v3669_v62 = vsel %vm1579_vm2, %v1571_v1, %v731_v56  ;;  %v259_v38 = vld [vmem:[%s3070_s30 + $0x170] sm:$0xff]  ;;  %v258_v1 = vld [vmem:[%s3070_s30 + $0x168] sm:$0xff] }
 0x102   : > { %4483 = vst [vmem:[#allocation42_spill] sm:$0xff] %v3666_v6  ;;  %4484 = vst [vmem:[#allocation43_spill] sm:$0xff] %v3669_v62  ;;  %1332 = vrot.lane.b32.xlu1 %v3107_v8, %s2985_s4  ;;  %950 = vrot.lane.b32.xlu0 %v3110_v9, %s2982_s7  ;;  %v1576_v9 = vsel %vm1546_vm1, %v257_v25, %v3456_v45  ;;  %v1577_v45 = vsel %vm1546_vm1, %v258_v1, %v4489_v12  ;;  %v4496_v12 = vld [vmem:[#allocation11_spill] sm:$0xff]  ;;  %v4506_v62 = vld [vmem:[#allocation18_spill] sm:$0xff] }
 0x104   : > { %v737_v50 = vpop.permute.xlu1 %736  ;;  %v735_v63 = vpop.permute.xlu0 %734 }
 0x105   : > { %v3682_v18 = vsel %vm1579_vm2, %v1574_v49, %v737_v50  ;;  %v3685_v21 = vsel %vm1579_vm2, %v1573_v3, %v735_v63  ;;  %v4492_v50 = vld [vmem:[#allocation9_spill] sm:$0xff] }
 0x106   : > { %4485 = vst [vmem:[#allocation44_spill] sm:$0xff] %v3682_v18  ;;  %4486 = vst [vmem:[#allocation45_spill] sm:$0xff] %v3685_v21  ;;  %952 = vrot.lane.b32.xlu1 %v3107_v8, %s2982_s7  ;;  %1458 = vrot.lane.b32.xlu0 %v3216_v41, %s2986_s8  ;;  %v1578_v8 = vsel %vm1546_vm1, %v259_v38, %v3470_v43  ;;  %v4504_v18 = vld [vmem:[#allocation12_spill] sm:$0xff]  ;;  %v4505_v21 = vld [vmem:[#allocation19_spill] sm:$0xff] }
 0x108   : > { %v741_v47 = vpop.permute.xlu1 %740  ;;  %v739_v53 = vpop.permute.xlu0 %738 }
 0x109   : > { %v3698_v22 = vsel %vm1579_vm2, %v1576_v9, %v741_v47  ;;  %v3701_v56 = vsel %vm1579_vm2, %v1575_v14, %v739_v53  ;;  %v4494_v9 = vld [vmem:[#allocation15_spill] sm:$0xff]  ;;  %v4495_v47 = vld [vmem:[#allocation14_spill] sm:$0xff] }
 0x10a   : > { %4487 = vst [vmem:[#allocation46_spill] sm:$0xff] %v3698_v22  ;;  %4488 = vst [vmem:[#allocation47_spill] sm:$0xff] %v3701_v56  ;;  %1460 = vrot.lane.b32.xlu1 %v3213_v40, %s2986_s8  ;;  %1078 = vrot.lane.b32.xlu0 %v3216_v41, %s2983_s18  ;;  %v4502_v22 = vld [vmem:[#allocation13_spill] sm:$0xff] }
 0x10c   : > { %v745_v57 = vpop.permute.xlu1 %744  ;;  %v743_v36 = vpop.permute.xlu0 %742 }
 0x10d   : > { %v3712_v49 = vsel %vm1579_vm2, %v1578_v8, %v745_v57  ;;  %v3715_v3 = vsel %vm1579_vm2, %v1577_v45, %v743_v36  ;;  %v4497_v36 = vld [vmem:[#allocation10_spill] sm:$0xff] }
 0x10e   : > { %4490 = vst [vmem:[#allocation33_spill] sm:$0xff] %v3712_v49  ;;  %4491 = vst [vmem:[#allocation48_spill] sm:$0xff] %v3715_v3  ;;  %1206 = vrot.lane.b32.xlu1 %v3366_v55, %s2984_s27  ;;  %1080 = vrot.lane.b32.xlu0 %v3213_v40, %s2983_s18 }
 0x110   : > { %v3721_v41 = vpop.permute.xlu1 %812  ;;  %v3723_v43 = vpop.permute.xlu0 %810 }
 0x112   : > { %1334 = vrot.lane.b32.xlu1 %v4492_v50, %s2985_s4  ;;  %1208 = vrot.lane.b32.xlu0 %v3363_v54, %s2984_s27 }
 0x114   : > { %v3729_v63 = vpop.permute.xlu1 %816  ;;  %v3731_v25 = vpop.permute.xlu0 %814 }
 0x116   : > { %1336 = vrot.lane.b32.xlu1 %v4493_v39, %s2985_s4  ;;  %954 = vrot.lane.b32.xlu0 %v4492_v50, %s2982_s7 }
 0x118   : > { %v3737_v40 = vpop.permute.xlu1 %820  ;;  %v3739_v55 = vpop.permute.xlu0 %818 }
 0x11a   : > { %956 = vrot.lane.b32.xlu1 %v4493_v39, %s2982_s7  ;;  %1462 = vrot.lane.b32.xlu0 %v4494_v9, %s2986_s8  ;;  %v4498_v39 = vld [vmem:[#allocation17_spill] sm:$0xff] }
 0x11c   : > { %v3745_v54 = vpop.permute.xlu1 %824  ;;  %v3747_v14 = vpop.permute.xlu0 %822 }
 0x11e   : > { %1464 = vrot.lane.b32.xlu1 %v4495_v47, %s2986_s8  ;;  %1082 = vrot.lane.b32.xlu0 %v4494_v9, %s2983_s18 }
 0x120   : > { %v3753_v53 = vpop.permute.xlu1 %828  ;;  %v3755_v38 = vpop.permute.xlu0 %826 }
 0x122   : > { %1210 = vrot.lane.b32.xlu1 %v3380_v59, %s2984_s27  ;;  %1084 = vrot.lane.b32.xlu0 %v4495_v47, %s2983_s18  ;;  %v4499_v47 = vld [vmem:[#allocation16_spill] sm:$0xff] }
 0x124   : > { %v3761_v1 = vpop.permute.xlu1 %832  ;;  %v3763_v8 = vpop.permute.xlu0 %830 }
 0x126   : > { %1338 = vrot.lane.b32.xlu1 %v4496_v12, %s2985_s4  ;;  %1212 = vrot.lane.b32.xlu0 %v3377_v58, %s2984_s27 }
 0x128   : > { %v3769_v45 = vpop.permute.xlu1 %836  ;;  %v3771_v57 = vpop.permute.xlu0 %834 }
 0x12a   : > { %1340 = vrot.lane.b32.xlu1 %v4497_v36, %s2985_s4  ;;  %958 = vrot.lane.b32.xlu0 %v4496_v12, %s2982_s7 }
 0x12c   : > { %v3777_v59 = vpop.permute.xlu1 %840  ;;  %v3779_v50 = vpop.permute.xlu0 %838 }
 0x12e   : > { %960 = vrot.lane.b32.xlu1 %v4497_v36, %s2982_s7  ;;  %1466 = vrot.lane.b32.xlu0 %v4498_v39, %s2986_s8 }
 0x130   : > { %v3785_v58 = vpop.permute.xlu1 %844  ;;  %v3787_v9 = vpop.permute.xlu0 %842 }
 0x132   : > { %1468 = vrot.lane.b32.xlu1 %v4499_v47, %s2986_s8  ;;  %1086 = vrot.lane.b32.xlu0 %v4498_v39, %s2983_s18 }
 0x134   : > { %v3793_v12 = vpop.permute.xlu1 %848  ;;  %v3795_v49 = vpop.permute.xlu0 %846 }
 0x136   : > { %1214 = vrot.lane.b32.xlu1 %v3394_v17, %s2984_s27  ;;  %1088 = vrot.lane.b32.xlu0 %v4499_v47, %s2983_s18 }
 0x138   : > { %v3801_v36 = vpop.permute.xlu1 %852  ;;  %v3803_v3 = vpop.permute.xlu0 %850 }
 0x139   : > { %4500 = vst [vmem:[#allocation9_spill] sm:$0xff] %v3801_v36  ;;  %4501 = vst [vmem:[#allocation8_spill] sm:$0xff] %v3803_v3 }
 0x13a   : > { %1342 = vrot.lane.b32.xlu1 %v4502_v22, %s2985_s4  ;;  %1216 = vrot.lane.b32.xlu0 %v3391_v16, %s2984_s27 }
 0x13c   : > { %v939_v39 = vpop.permute.xlu1 %938  ;;  %v3809_v56 = vpop.permute.xlu0 %854 }
 0x13d   : > { %4503 = vst [vmem:[#allocation15_spill] sm:$0xff] %v3809_v56  ;;  %v4507_v56 = vld [vmem:[#allocation23_spill] sm:$0xff] }
 0x13e   : > { %1344 = vrot.lane.b32.xlu1 %v4504_v18, %s2985_s4  ;;  %962 = vrot.lane.b32.xlu0 %v4502_v22, %s2982_s7  ;;  %v1547_v30 = vsel %vm1546_vm1, %v228_v7, %v4507_v56 }
 0x13f   : > { %v1580_v36 = vsel %vm1579_vm2, %v1547_v30, %v3486_v42  ;;  %v4509_v42 = vld [vmem:[#allocation34_spill] sm:$0xff] }
 0x140   : > { %v1067_v17 = vpop.permute.xlu1 %1066  ;;  %v941_v47 = vpop.permute.xlu0 %940  ;;  %v1613_v52 = vsel %vm1612_vm3, %v1580_v36, %v3723_v43  ;;  %v2604_v36 = vld [vmem:[%s3070_s30 + $0xc9] sm:$0xff] }
 0x141   : > { %v1646_v56 = vsel %vm1645_vm4, %v1613_v52, %v939_v39 }
 0x142   : > { %964 = vrot.lane.b32.xlu1 %v4504_v18, %s2982_s7  ;;  %1470 = vrot.lane.b32.xlu0 %v4505_v21, %s2986_s8  ;;  %v229_v18 = vld [vmem:[%s3070_s30 + $0x8] sm:$0xff] }
 0x144   : > { %v1195_v16 = vpop.permute.xlu1 %1194  ;;  %v1069_v6 = vpop.permute.xlu0 %1068 }
 0x146   : > { %1472 = vrot.lane.b32.xlu1 %v4506_v62, %s2986_s8  ;;  %1090 = vrot.lane.b32.xlu0 %v4505_v21, %s2983_s18  ;;  %v2603_v21 = vld [vmem:[%s3070_s30 + $0xc1] sm:$0xff] }
 0x148   : > { %v1323_v22 = vpop.permute.xlu1 %1322  ;;  %v1197_v51 = vpop.permute.xlu0 %1196 }
 0x14a   : > { %1218 = vrot.lane.b32.xlu1 %v3408_v23, %s2984_s27  ;;  %1092 = vrot.lane.b32.xlu0 %v4506_v62, %s2983_s18  ;;  %v4508_v23 = vld [vmem:[#allocation25_spill] sm:$0xff]  ;;  %v1679_v62 = vsel %vm1678_vm5, %v1646_v56, %v1067_v17 }
 0x14b   : > { %v1548_v32 = vsel %vm1546_vm1, %v229_v18, %v4508_v23  ;;  %v1712_v43 = vsel %vm1711_vm6, %v1679_v62, %v1195_v16 }
 0x14c   : > { %v1325_v3 = vpop.permute.xlu1 %1324  ;;  %v943_v7 = vpop.permute.xlu0 %942  ;;  %v1581_v30 = vsel %vm1579_vm2, %v1548_v32, %v4509_v42  ;;  %v1745_v39 = vsel %vm1744_vm7, %v1712_v43, %v1323_v22  ;;  %v4513_v43 = vld [vmem:[#allocation29_spill] sm:$0xff] }
 0x14d   : > { %v1614_v52 = vsel %vm1612_vm3, %v1581_v30, %v3721_v41  ;;  %v4512_v30 = vld [vmem:[#allocation22_spill] sm:$0xff] }
 0x14e   : > { %1346 = vrot.lane.b32.xlu1 %v2603_v21, %s2985_s4  ;;  %1220 = vrot.lane.b32.xlu0 %v3405_v19, %s2984_s27  ;;  %v1647_v17 = vsel %vm1645_vm4, %v1614_v52, %v941_v47  ;;  %v4510_v47 = vld [vmem:[#allocation21_spill] sm:$0xff] }
 0x14f   : > { %v1680_v19 = vsel %vm1678_vm5, %v1647_v17, %v1069_v6 }
 0x150   : > { %v945_v18 = vpop.permute.xlu1 %944  ;;  %v1451_v23 = vpop.permute.xlu0 %1450  ;;  %v1713_v32 = vsel %vm1711_vm6, %v1680_v19, %v1197_v51  ;;  %v4511_v51 = vld [vmem:[#allocation20_spill] sm:$0xff] }
 0x151   : > { %v1778_v56 = vsel %vm1777_vm8, %v1745_v39, %v1451_v23  ;;  %v1746_v41 = vsel %vm1744_vm7, %v1713_v32, %v1325_v3  ;;  %v2605_v39 = vld [vmem:[%s3070_s30 + $0xd9] sm:$0xff]  ;;  %v4514_v32 = vld [vmem:[#allocation24_spill] sm:$0xff] }
 0x152   : > { %1348 = vrot.lane.b32.xlu1 %v2604_v36, %s2985_s4  ;;  %966 = vrot.lane.b32.xlu0 %v2603_v21, %s2982_s7 }
 0x153   : > { %2743 = vmatprep.mubr.msk.f32.mxu0 %vm1815_vm9, %v1778_v56 }
 0x154   : > { %v1453_v16 = vpop.permute.xlu1 %1452  ;;  %v1071_v22 = vpop.permute.xlu0 %1070 }
 0x155   : > { %v1779_v62 = vsel %vm1777_vm8, %v1746_v41, %v1453_v16  ;;  %v4515_v41 = vld [vmem:[#allocation30_spill] sm:$0xff] }
 0x156   : > { %968 = vrot.lane.b32.xlu1 %v2604_v36, %s2982_s7  ;;  %1474 = vrot.lane.b32.xlu0 %v4510_v47, %s2986_s8  ;;  %v1549_v36 = vsel %vm1546_vm1, %v4513_v43, %v4512_v30  ;;  %v1550_v16 = vsel %vm1546_vm1, %v4515_v41, %v4514_v32 }
 0x157   : > { %2744 = vmatmul.mubr.msk.f32.vlgmr.msra.gmra.mxu0 %vm1815_vm9, %v1779_v62  ;;  %v1582_v52 = vsel %vm1579_vm2, %v1549_v36, %v3497_v10  ;;  %v1583_v10 = vsel %vm1579_vm2, %v1550_v16, %v3495_v2  ;;  %v2606_v62 = vld [vmem:[%s3070_s30 + $0xe1] sm:$0xff]  ;;  %v2607_v16 = vld [vmem:[%s3070_s30 + $0xf1] sm:$0xff] }
 0x158   : > { %v1199_v6 = vpop.permute.xlu1 %1198  ;;  %v1073_v21 = vpop.permute.xlu0 %1072  ;;  %v1615_v23 = vsel %vm1612_vm3, %v1582_v52, %v3731_v25 }
 0x159   : > { %v1648_v19 = vsel %vm1645_vm4, %v1615_v23, %v943_v7  ;;  %v1616_v7 = vsel %vm1612_vm3, %v1583_v10, %v3729_v63  ;;  %v2637_v63 = vld [vmem:[%s3070_s30 + $0xda] sm:$0xff] }
 0x15a   : > { %1476 = vrot.lane.b32.xlu1 %v4511_v51, %s2986_s8  ;;  %1094 = vrot.lane.b32.xlu0 %v4510_v47, %s2983_s18 }
 0x15c   : > { %v1327_v3 = vpop.permute.xlu1 %1326  ;;  %v1201_v42 = vpop.permute.xlu0 %1200 }
 0x15e   : > { %1222 = vrot.lane.b32.xlu1 %v3422_v48, %s2984_s27  ;;  %1096 = vrot.lane.b32.xlu0 %v4511_v51, %s2983_s18  ;;  %v1681_v48 = vsel %vm1678_vm5, %v1648_v19, %v1071_v22  ;;  %v1649_v22 = vsel %vm1645_vm4, %v1616_v7, %v945_v18  ;;  %v4517_v19 = vld [vmem:[#allocation32_spill] sm:$0xff]  ;;  %v4518_v7 = vld [vmem:[#allocation26_spill] sm:$0xff] }
 0x15f   : > { %v1714_v25 = vsel %vm1711_vm6, %v1681_v48, %v1199_v6 }
 0x160   : > { %v1329_v17 = vpop.permute.xlu1 %1328  ;;  %v947_v56 = vpop.permute.xlu0 %946  ;;  %v1747_v47 = vsel %vm1744_vm7, %v1714_v25, %v1327_v3 }
 0x162   : > { %1350 = vrot.lane.b32.xlu1 %v2605_v39, %s2985_s4  ;;  %1224 = vrot.lane.b32.xlu0 %v3419_v60, %s2984_s27  ;;  %v1682_v60 = vsel %vm1678_vm5, %v1649_v22, %v1073_v21  ;;  %v2638_v21 = vld [vmem:[%s3070_s30 + $0xe2] sm:$0xff] }
 0x163   : > { %v1715_v2 = vsel %vm1711_vm6, %v1682_v60, %v1201_v42 }
 0x164   : > { %v949_v51 = vpop.permute.xlu1 %948  ;;  %v1455_v30 = vpop.permute.xlu0 %1454  ;;  %v1748_v6 = vsel %vm1744_vm7, %v1715_v2, %v1329_v17  ;;  %v4516_v17 = vld [vmem:[#allocation27_spill] sm:$0xff] }
 0x165   : > { %v1780_v43 = vsel %vm1777_vm8, %v1747_v47, %v1455_v30  ;;  %v1551_v32 = vsel %vm1546_vm1, %v4517_v19, %v4516_v17  ;;  %v4519_v47 = vld [vmem:[#allocation31_spill] sm:$0xff] }
 0x166   : > { %1352 = vrot.lane.b32.xlu1 %v2606_v62, %s2985_s4  ;;  %970 = vrot.lane.b32.xlu0 %v2605_v39, %s2982_s7  ;;  %v1584_v41 = vsel %vm1579_vm2, %v1551_v32, %v3508_v34  ;;  %v1552_v30 = vsel %vm1546_vm1, %v4519_v47, %v4518_v7  ;;  %v4521_v32 = vld [vmem:[#allocation28_spill] sm:$0xff] }
 0x167   : > { %2746 = vmatprep.mubr.msk.f32.mxu0 %vm1815_vm9, %v1780_v43  ;;  %v1617_v48 = vsel %vm1612_vm3, %v1584_v41, %v3739_v55  ;;  %v2608_v43 = vld [vmem:[%s3070_s30 + $0xf9] sm:$0xff]  ;;  %v1553_v41 = vsel %vm1546_vm1, %v3338_v31, %v4521_v32  ;;  %v2610_v31 = vld [vmem:[%s3070_s30 + $0x111] sm:$0xff] }
 0x168   : > { %v1457_v3 = vpop.permute.xlu1 %1456  ;;  %v1075_v36 = vpop.permute.xlu0 %1074 }
 0x169   : > { %v1781_v18 = vsel %vm1777_vm8, %v1748_v6, %v1457_v3 }
 0x16a   : > { %972 = vrot.lane.b32.xlu1 %v2606_v62, %s2982_s7  ;;  %1478 = vrot.lane.b32.xlu0 %v2637_v63, %s2986_s8  ;;  %v1650_v62 = vsel %vm1645_vm4, %v1617_v48, %v947_v56 }
 0x16b   : > { %2747 = vmatmul.mubr.msk.f32.gmra.mxu0 %vm1815_vm9, %v1781_v18  ;;  %v1683_v22 = vsel %vm1678_vm5, %v1650_v62, %v1075_v36 }
 0x16c   : > { %v1203_v52 = vpop.permute.xlu1 %1202  ;;  %v1077_v39 = vpop.permute.xlu0 %1076 }
 0x16d   : > { %v1716_v55 = vsel %vm1711_vm6, %v1683_v22, %v1203_v52 }
 0x16e   : > { %1480 = vrot.lane.b32.xlu1 %v2638_v21, %s2986_s8  ;;  %1098 = vrot.lane.b32.xlu0 %v2637_v63, %s2983_s18 }
 0x170   : > { %v1331_v42 = vpop.permute.xlu1 %1330  ;;  %v1205_v23 = vpop.permute.xlu0 %1204 }
 0x171   : > { %v1749_v60 = vsel %vm1744_vm7, %v1716_v55, %v1331_v42 }
 0x172   : > { %1226 = vrot.lane.b32.xlu1 %v3436_v46, %s2984_s27  ;;  %1100 = vrot.lane.b32.xlu0 %v2638_v21, %s2983_s18  ;;  %v4520_v46 = vld [vmem:[#allocation35_spill] sm:$0xff] }
 0x173   : > { %v1585_v34 = vsel %vm1579_vm2, %v1552_v30, %v4520_v46  ;;  %v1620_v46 = vsel %vm1612_vm3, %v3520_v11, %v3745_v54  ;;  %v2641_v11 = vld [vmem:[%s3070_s30 + $0x10a] sm:$0xff] }
 0x174   : > { %v1333_v10 = vpop.permute.xlu1 %1332  ;;  %v951_v25 = vpop.permute.xlu0 %950  ;;  %v1618_v56 = vsel %vm1612_vm3, %v1585_v34, %v3737_v40  ;;  %v2639_v40 = vld [vmem:[%s3070_s30 + $0xf2] sm:$0xff] }
 0x175   : > { %v1651_v6 = vsel %vm1645_vm4, %v1618_v56, %v949_v51 }
 0x176   : > { %1354 = vrot.lane.b32.xlu1 %v2607_v16, %s2985_s4  ;;  %1228 = vrot.lane.b32.xlu0 %v3433_v61, %s2984_s27  ;;  %v1684_v61 = vsel %vm1678_vm5, %v1651_v6, %v1077_v39  ;;  %v2640_v39 = vld [vmem:[%s3070_s30 + $0xfa] sm:$0xff]  ;;  %v2642_v6 = vld [vmem:[%s3070_s30 + $0x112] sm:$0xff] }
 0x177   : > { %v1717_v36 = vsel %vm1711_vm6, %v1684_v61, %v1205_v23 }
 0x178   : > { %v953_v2 = vpop.permute.xlu1 %952  ;;  %v1459_v63 = vpop.permute.xlu0 %1458  ;;  %v1750_v18 = vsel %vm1744_vm7, %v1717_v36, %v1333_v10  ;;  %v2609_v10 = vld [vmem:[%s3070_s30 + $0x109] sm:$0xff] }
 0x179   : > { %v1782_v3 = vsel %vm1777_vm8, %v1749_v60, %v1459_v63 }
 0x17a   : > { %1356 = vrot.lane.b32.xlu1 %v2608_v43, %s2985_s4  ;;  %974 = vrot.lane.b32.xlu0 %v2607_v16, %s2982_s7  ;;  %v4522_v16 = vld [vmem:[#allocation36_spill] sm:$0xff] }
 0x17b   : > { %2749 = vmatprep.mubr.msk.f32.mxu0 %vm1815_vm9, %v1782_v3  ;;  %v1586_v48 = vsel %vm1579_vm2, %v1553_v41, %v4522_v16 }
 0x17c   : > { %v1461_v21 = vpop.permute.xlu1 %1460  ;;  %v1079_v52 = vpop.permute.xlu0 %1078  ;;  %v1619_v62 = vsel %vm1612_vm3, %v1586_v48, %v3747_v14 }
 0x17d   : > { %v1783_v51 = vsel %vm1777_vm8, %v1750_v18, %v1461_v21  ;;  %v1652_v30 = vsel %vm1645_vm4, %v1619_v62, %v951_v25  ;;  %v1653_v25 = vsel %vm1645_vm4, %v1620_v46, %v953_v2  ;;  %v2611_v18 = vld [vmem:[%s3070_s30 + $0x121] sm:$0xff]  ;;  %v1621_v21 = vsel %vm1612_vm3, %v3536_v35, %v3755_v38 }
 0x17e   : > { %976 = vrot.lane.b32.xlu1 %v2608_v43, %s2982_s7  ;;  %1482 = vrot.lane.b32.xlu0 %v2639_v40, %s2986_s8  ;;  %v1685_v22 = vsel %vm1678_vm5, %v1652_v30, %v1079_v52  ;;  %v2550_v30 = vld [vmem:[%s3070_s30 + $0x12a] sm:$0xff]  ;;  %v1623_v46 = vsel %vm1612_vm3, %v3552_v27, %v3763_v8 }
 0x17f   : > { %2750 = vmatmul.mubr.msk.f32.gmra.mxu0 %vm1815_vm9, %v1783_v51 }
 0x180   : > { %v1207_v42 = vpop.permute.xlu1 %1206  ;;  %v1081_v17 = vpop.permute.xlu0 %1080 }
 0x181   : > { %v1686_v56 = vsel %vm1678_vm5, %v1653_v25, %v1081_v17  ;;  %v1622_v17 = vsel %vm1612_vm3, %v3533_v26, %v3753_v53  ;;  %v2643_v26 = vld [vmem:[%s3070_s30 + $0x122] sm:$0xff] }
 0x182   : > { %1484 = vrot.lane.b32.xlu1 %v2640_v39, %s2986_s8  ;;  %1102 = vrot.lane.b32.xlu0 %v2639_v40, %s2983_s18  ;;  %v2612_v53 = vld [vmem:[%s3070_s30 + $0x129] sm:$0xff] }
 0x184   : > { %v1335_v23 = vpop.permute.xlu1 %1334  ;;  %v1209_v19 = vpop.permute.xlu0 %1208 }
 0x186   : > { %1230 = vrot.lane.b32.xlu1 %v3450_v44, %s2984_s27  ;;  %1104 = vrot.lane.b32.xlu0 %v2640_v39, %s2983_s18  ;;  %v1718_v44 = vsel %vm1711_vm6, %v1685_v22, %v1207_v42 }
 0x187   : > { %v1751_v14 = vsel %vm1744_vm7, %v1718_v44, %v1335_v23 }
 0x188   : > { %v1337_v7 = vpop.permute.xlu1 %1336  ;;  %v955_v47 = vpop.permute.xlu0 %954 }
 0x189   : > { %v1654_v39 = vsel %vm1645_vm4, %v1621_v21, %v955_v47 }
 0x18a   : > { %1358 = vrot.lane.b32.xlu1 %v2609_v10, %s2985_s4  ;;  %1232 = vrot.lane.b32.xlu0 %v3447_v15, %s2984_s27  ;;  %v1719_v15 = vsel %vm1711_vm6, %v1686_v56, %v1209_v19  ;;  %v2613_v56 = vld [vmem:[%s3070_s30 + $0x139] sm:$0xff] }
 0x18b   : > { %v1752_v54 = vsel %vm1744_vm7, %v1719_v15, %v1337_v7  ;;  %v2582_v15 = vld [vmem:[%s3070_s30 + $0x140] sm:$0xff] }
 0x18c   : > { %v957_v34 = vpop.permute.xlu1 %956  ;;  %v1463_v55 = vpop.permute.xlu0 %1462 }
 0x18d   : > { %v1784_v43 = vsel %vm1777_vm8, %v1751_v14, %v1463_v55  ;;  %v1655_v19 = vsel %vm1645_vm4, %v1622_v17, %v957_v34 }
 0x18e   : > { %1360 = vrot.lane.b32.xlu1 %v2610_v31, %s2985_s4  ;;  %978 = vrot.lane.b32.xlu0 %v2609_v10, %s2982_s7 }
 0x18f   : > { %2752 = vmatprep.mubr.msk.f32.mxu0 %vm1815_vm9, %v1784_v43 }
 0x190   : > { %v1465_v60 = vpop.permute.xlu1 %1464  ;;  %v1083_v63 = vpop.permute.xlu0 %1082 }
 0x191   : > { %v1785_v2 = vsel %vm1777_vm8, %v1752_v54, %v1465_v60  ;;  %v1687_v42 = vsel %vm1678_vm5, %v1654_v39, %v1083_v63  ;;  %v2552_v39 = vld [vmem:[%s3070_s30 + $0x142] sm:$0xff] }
 0x192   : > { %980 = vrot.lane.b32.xlu1 %v2610_v31, %s2982_s7  ;;  %1486 = vrot.lane.b32.xlu0 %v2641_v11, %s2986_s8  ;;  %v2487_v31 = vld [vmem:[%s3070_s30 + $0x138] sm:$0xff] }
 0x193   : > { %2753 = vmatmul.mubr.msk.f32.gmra.mxu0 %vm1815_vm9, %v1785_v2 }
 0x194   : > { %v1211_v3 = vpop.permute.xlu1 %1210  ;;  %v1085_v61 = vpop.permute.xlu0 %1084 }
 0x195   : > { %v1688_v41 = vsel %vm1678_vm5, %v1655_v19, %v1085_v61  ;;  %v2489_v19 = vld [vmem:[%s3070_s30 + $0x150] sm:$0xff] }
 0x196   : > { %1488 = vrot.lane.b32.xlu1 %v2642_v6, %s2986_s8  ;;  %1106 = vrot.lane.b32.xlu0 %v2641_v11, %s2983_s18  ;;  %v1624_v11 = vsel %vm1612_vm3, %v3549_v0, %v3761_v1 }
 0x198   : > { %v1339_v36 = vpop.permute.xlu1 %1338  ;;  %v1213_v40 = vpop.permute.xlu0 %1212 }
 0x199   : > { %v1721_v16 = vsel %vm1711_vm6, %v1688_v41, %v1213_v40  ;;  %v2614_v40 = vld [vmem:[%s3070_s30 + $0x141] sm:$0xff] }
 0x19a   : > { %1234 = vrot.lane.b32.xlu1 %v3461_v13, %s2984_s27  ;;  %1108 = vrot.lane.b32.xlu0 %v2642_v6, %s2983_s18  ;;  %v1720_v13 = vsel %vm1711_vm6, %v1687_v42, %v1211_v3  ;;  %v1625_v42 = vsel %vm1612_vm3, %v3568_v24, %v3771_v57 }
 0x19b   : > { %v1753_v35 = vsel %vm1744_vm7, %v1720_v13, %v1339_v36  ;;  %v2645_v36 = vld [vmem:[%s3070_s30 + $0x13a] sm:$0xff] }
 0x19c   : > { %v1341_v52 = vpop.permute.xlu1 %1340  ;;  %v959_v51 = vpop.permute.xlu0 %958 }
 0x19d   : > { %v1754_v48 = vsel %vm1744_vm7, %v1721_v16, %v1341_v52  ;;  %v1656_v55 = vsel %vm1645_vm4, %v1623_v46, %v959_v51 }
 0x19e   : > { %1362 = vrot.lane.b32.xlu1 %v2611_v18, %s2985_s4  ;;  %1236 = vrot.lane.b32.xlu0 %v3645_v28, %s2984_s27 }
 0x1a0   : > { %v961_v38 = vpop.permute.xlu1 %960  ;;  %v1467_v23 = vpop.permute.xlu0 %1466 }
 0x1a1   : > { %v1786_v32 = vsel %vm1777_vm8, %v1753_v35, %v1467_v23  ;;  %v1657_v60 = vsel %vm1645_vm4, %v1624_v11, %v961_v38  ;;  %v1628_v11 = vsel %vm1612_vm3, %v3581_v5, %v3777_v59  ;;  %v2491_v5 = vld [vmem:[%s3070_s30 + $0x168] sm:$0xff] }
 0x1a2   : > { %982 = vrot.lane.b32.xlu1 %v2611_v18, %s2982_s7  ;;  %856 = vrot.lane.b32.xlu0 %v3645_v28, %s2981_s6 }
 0x1a3   : > { %2755 = vmatprep.mubr.msk.f32.mxu0 %vm1815_vm9, %v1786_v32  ;;  %v1626_v32 = vsel %vm1612_vm3, %v3565_v4, %v3769_v45  ;;  %v2615_v4 = vld [vmem:[%s3070_s30 + $0x151] sm:$0xff] }
 0x1a4   : > { %v1469_v10 = vpop.permute.xlu1 %1468  ;;  %v1087_v62 = vpop.permute.xlu0 %1086  ;;  %v2584_v45 = vld [vmem:[%s3070_s30 + $0x158] sm:$0xff] }
 0x1a5   : > { %v1787_v7 = vsel %vm1777_vm8, %v1754_v48, %v1469_v10  ;;  %v1689_v25 = vsel %vm1678_vm5, %v1656_v55, %v1087_v62 }
 0x1a6   : > { %1490 = vrot.lane.b32.xlu1 %v2643_v26, %s2986_s8  ;;  %1364 = vrot.lane.b32.xlu0 %v2612_v53, %s2985_s4 }
 0x1a7   : > { %2756 = vmatmul.mubr.msk.f32.gmra.mxu0 %vm1815_vm9, %v1787_v7 }
 0x1a8   : > { %v1215_v28 = vpop.permute.xlu1 %1214  ;;  %v1089_v47 = vpop.permute.xlu0 %1088 }
 0x1a9   : > { %v1722_v43 = vsel %vm1711_vm6, %v1689_v25, %v1215_v28  ;;  %v1690_v2 = vsel %vm1678_vm5, %v1657_v60, %v1089_v47 }
 0x1aa   : > { %1110 = vrot.lane.b32.xlu1 %v2643_v26, %s2983_s18  ;;  %984 = vrot.lane.b32.xlu0 %v2612_v53, %s2982_s7 }
 0x1ac   : > { %v1343_v22 = vpop.permute.xlu1 %1342  ;;  %v1217_v44 = vpop.permute.xlu0 %1216 }
 0x1ad   : > { %v1755_v27 = vsel %vm1744_vm7, %v1722_v43, %v1343_v22  ;;  %v1723_v6 = vsel %vm1711_vm6, %v1690_v2, %v1217_v44  ;;  %v2647_v22 = vld [vmem:[%s3070_s30 + $0x152] sm:$0xff] }
 0x1ae   : > { %1112 = vrot.lane.b32.xlu1 %v2550_v30, %s2983_s18  ;;  %1492 = vrot.lane.b32.xlu0 %v2550_v30, %s2986_s8  ;;  %v2616_v44 = vld [vmem:[%s3070_s30 + $0x159] sm:$0xff] }
 0x1b0   : > { %v1345_v14 = vpop.permute.xlu1 %1344  ;;  %v963_v34 = vpop.permute.xlu0 %962 }
 0x1b1   : > { %v1756_v0 = vsel %vm1744_vm7, %v1723_v6, %v1345_v14  ;;  %v1658_v35 = vsel %vm1645_vm4, %v1625_v42, %v963_v34  ;;  %v1627_v14 = vsel %vm1612_vm3, %v3584_v37, %v3779_v50 }
 0x1b2   : > { %858 = vrot.lane.b32.xlu1 %v2487_v31, %s2981_s6  ;;  %1238 = vrot.lane.b32.xlu0 %v2487_v31, %s2984_s27 }
 0x1b4   : > { %v965_v8 = vpop.permute.xlu1 %964  ;;  %v1471_v54 = vpop.permute.xlu0 %1470 }
 0x1b5   : > { %v1788_v63 = vsel %vm1777_vm8, %v1755_v27, %v1471_v54  ;;  %v1659_v16 = vsel %vm1645_vm4, %v1626_v32, %v965_v8 }
 0x1b6   : > { %1366 = vrot.lane.b32.xlu1 %v2613_v56, %s2985_s4  ;;  %1240 = vrot.lane.b32.xlu0 %v2582_v15, %s2984_s27 }
 0x1b7   : > { %2758 = vmatprep.mubr.msk.f32.mxu0 %vm1815_vm9, %v1788_v63 }
 0x1b8   : > { %v1473_v1 = vpop.permute.xlu1 %1472  ;;  %v1091_v3 = vpop.permute.xlu0 %1090 }
 0x1b9   : > { %v1789_v61 = vsel %vm1777_vm8, %v1756_v0, %v1473_v1  ;;  %v1691_v38 = vsel %vm1678_vm5, %v1658_v35, %v1091_v3  ;;  %v2617_v1 = vld [vmem:[%s3070_s30 + $0x169] sm:$0xff] }
 0x1ba   : > { %986 = vrot.lane.b32.xlu1 %v2613_v56, %s2982_s7  ;;  %860 = vrot.lane.b32.xlu0 %v2582_v15, %s2981_s6  ;;  %v2554_v15 = vld [vmem:[%s3070_s30 + $0x15a] sm:$0xff]  ;;  %v2586_v3 = vld [vmem:[%s3070_s30 + $0x170] sm:$0xff] }
 0x1bb   : > { %2759 = vmatmul.mubr.msk.f32.gmra.mxu0 %vm1815_vm9, %v1789_v61 }
 0x1bc   : > { %v1219_v18 = vpop.permute.xlu1 %1218  ;;  %v1093_v21 = vpop.permute.xlu0 %1092 }
 0x1bd   : > { %v1724_v23 = vsel %vm1711_vm6, %v1691_v38, %v1219_v18  ;;  %v1692_v53 = vsel %vm1678_vm5, %v1659_v16, %v1093_v21  ;;  %v2649_v21 = vld [vmem:[%s3070_s30 + $0x16a] sm:$0xff]  ;;  %v1630_v38 = vsel %vm1612_vm3, %v3597_v29, %v3785_v58  ;;  %v2556_v29 = vld [vmem:[%s3070_s30 + $0x172] sm:$0xff] }
 0x1be   : > { %1494 = vrot.lane.b32.xlu1 %v2645_v36, %s2986_s8  ;;  %1368 = vrot.lane.b32.xlu0 %v2614_v40, %s2985_s4 }
 0x1c0   : > { %v1347_v52 = vpop.permute.xlu1 %1346  ;;  %v1221_v51 = vpop.permute.xlu0 %1220 }
 0x1c1   : > { %v1757_v24 = vsel %vm1744_vm7, %v1724_v23, %v1347_v52  ;;  %v1725_v48 = vsel %vm1711_vm6, %v1692_v53, %v1221_v51  ;;  %v2618_v52 = vld [vmem:[%s3070_s30 + $0x171] sm:$0xff]  ;;  %v1629_v51 = vsel %vm1612_vm3, %v3600_v20, %v3787_v9  ;;  %v2493_v53 = vld [vmem:[%s3070_s30 + $0x180] sm:$0xff] }
 0x1c2   : > { %1114 = vrot.lane.b32.xlu1 %v2645_v36, %s2983_s18  ;;  %988 = vrot.lane.b32.xlu0 %v2614_v40, %s2982_s7 }
 0x1c4   : > { %v1349_v13 = vpop.permute.xlu1 %1348  ;;  %v967_v17 = vpop.permute.xlu0 %966 }
 0x1c5   : > { %v1758_v10 = vsel %vm1744_vm7, %v1725_v48, %v1349_v13  ;;  %v1660_v25 = vsel %vm1645_vm4, %v1627_v14, %v967_v17  ;;  %v2620_v14 = vld [vmem:[%s3070_s30 + $0x189] sm:$0xff] }
 0x1c6   : > { %1116 = vrot.lane.b32.xlu1 %v2552_v39, %s2983_s18  ;;  %1496 = vrot.lane.b32.xlu0 %v2552_v39, %s2986_s8 }
 0x1c8   : > { %v969_v57 = vpop.permute.xlu1 %968  ;;  %v1475_v41 = vpop.permute.xlu0 %1474 }
 0x1c9   : > { %v1790_v26 = vsel %vm1777_vm8, %v1757_v24, %v1475_v41  ;;  %v1661_v8 = vsel %vm1645_vm4, %v1628_v11, %v969_v57 }
 0x1ca   : > { %862 = vrot.lane.b32.xlu1 %v2489_v19, %s2981_s6  ;;  %1242 = vrot.lane.b32.xlu0 %v2489_v19, %s2984_s27 }
 0x1cb   : > { %2761 = vmatprep.mubr.msk.f32.mxu0 %vm1815_vm9, %v1790_v26 }
 0x1cc   : > { %v1477_v62 = vpop.permute.xlu1 %1476  ;;  %v1095_v7 = vpop.permute.xlu0 %1094 }
 0x1cd   : > { %v1791_v28 = vsel %vm1777_vm8, %v1758_v10, %v1477_v62  ;;  %v1693_v43 = vsel %vm1678_vm5, %v1660_v25, %v1095_v7  ;;  %v2588_v10 = vld [vmem:[%s3070_s30 + $0x188] sm:$0xff] }
 0x1ce   : > { %1370 = vrot.lane.b32.xlu1 %v2615_v4, %s2985_s4  ;;  %1244 = vrot.lane.b32.xlu0 %v2584_v45, %s2984_s27 }
 0x1cf   : > { %2762 = vmatmul.mubr.msk.f32.gmra.mxu0 %vm1815_vm9, %v1791_v28  ;;  %v1631_v28 = vsel %vm1612_vm3, %v3616_v33, %v3795_v49 }
 0x1d0   : > { %v1223_v47 = vpop.permute.xlu1 %1222  ;;  %v1097_v30 = vpop.permute.xlu0 %1096 }
 0x1d1   : > { %v1726_v56 = vsel %vm1711_vm6, %v1693_v43, %v1223_v47  ;;  %v1694_v60 = vsel %vm1678_vm5, %v1661_v8, %v1097_v30  ;;  %v2558_v8 = vld [vmem:[%s3070_s30 + $0x18a] sm:$0xff] }
 0x1d2   : > { %990 = vrot.lane.b32.xlu1 %v2615_v4, %s2982_s7  ;;  %864 = vrot.lane.b32.xlu0 %v2584_v45, %s2981_s6  ;;  %v2619_v45 = vld [vmem:[%s3070_s30 + $0x181] sm:$0xff] }
 0x1d4   : > { %v1351_v31 = vpop.permute.xlu1 %1350  ;;  %v1225_v46 = vpop.permute.xlu0 %1224 }
 0x1d5   : > { %v1759_v37 = vsel %vm1744_vm7, %v1726_v56, %v1351_v31  ;;  %v1727_v63 = vsel %vm1711_vm6, %v1694_v60, %v1225_v46  ;;  %v2651_v46 = vld [vmem:[%s3070_s30 + $0x182] sm:$0xff] }
 0x1d6   : > { %1498 = vrot.lane.b32.xlu1 %v2647_v22, %s2986_s8  ;;  %1372 = vrot.lane.b32.xlu0 %v2616_v44, %s2985_s4 }
 0x1d8   : > { %v1353_v34 = vpop.permute.xlu1 %1352  ;;  %v971_v55 = vpop.permute.xlu0 %970 }
 0x1d9   : > { %v1760_v59 = vsel %vm1744_vm7, %v1727_v63, %v1353_v34  ;;  %v1662_v13 = vsel %vm1645_vm4, %v1629_v51, %v971_v55  ;;  %v4523_v34 = vld [vmem:[#allocation37_spill] sm:$0xff]  ;;  %v2590_v63 = vld [vmem:[%s3070_s30 + $0x1a0] sm:$0xff] }
 0x1da   : > { %1118 = vrot.lane.b32.xlu1 %v2647_v22, %s2983_s18  ;;  %992 = vrot.lane.b32.xlu0 %v2616_v44, %s2982_s7  ;;  %v1632_v55 = vsel %vm1612_vm3, %v4523_v34, %v3793_v12 }
 0x1dc   : > { %v973_v50 = vpop.permute.xlu1 %972  ;;  %v1479_v27 = vpop.permute.xlu0 %1478 }
 0x1dd   : > { %v1792_v54 = vsel %vm1777_vm8, %v1759_v37, %v1479_v27  ;;  %v1663_v19 = vsel %vm1645_vm4, %v1630_v38, %v973_v50 }
 0x1de   : > { %1120 = vrot.lane.b32.xlu1 %v2554_v15, %s2983_s18  ;;  %1500 = vrot.lane.b32.xlu0 %v2554_v15, %s2986_s8 }
 0x1df   : > { %2764 = vmatprep.mubr.msk.f32.mxu0 %vm1815_vm9, %v1792_v54 }
 0x1e0   : > { %v1481_v2 = vpop.permute.xlu1 %1480  ;;  %v1099_v6 = vpop.permute.xlu0 %1098 }
 0x1e1   : > { %v1793_v0 = vsel %vm1777_vm8, %v1760_v59, %v1481_v2  ;;  %v1695_v17 = vsel %vm1678_vm5, %v1662_v13, %v1099_v6  ;;  %v2622_v6 = vld [vmem:[%s3070_s30 + $0x1a1] sm:$0xff] }
 0x1e2   : > { %866 = vrot.lane.b32.xlu1 %v2491_v5, %s2981_s6  ;;  %1246 = vrot.lane.b32.xlu0 %v2491_v5, %s2984_s27  ;;  %v2589_v5 = vld [vmem:[%s3070_s30 + $0x198] sm:$0xff] }
 0x1e3   : > { %2765 = vmatmul.mubr.msk.f32.gmra.mxu0 %vm1815_vm9, %v1793_v0  ;;  %v2621_v0 = vld [vmem:[%s3070_s30 + $0x199] sm:$0xff] }
 0x1e4   : > { %v1227_v61 = vpop.permute.xlu1 %1226  ;;  %v1101_v36 = vpop.permute.xlu0 %1100 }
 0x1e5   : > { %v1728_v35 = vsel %vm1711_vm6, %v1695_v17, %v1227_v61  ;;  %v1696_v24 = vsel %vm1678_vm5, %v1663_v19, %v1101_v36 }
 0x1e6   : > { %1374 = vrot.lane.b32.xlu1 %v2617_v1, %s2985_s4  ;;  %1248 = vrot.lane.b32.xlu0 %v2586_v3, %s2984_s27 }
 0x1e8   : > { %v1355_v40 = vpop.permute.xlu1 %1354  ;;  %v1229_v18 = vpop.permute.xlu0 %1228 }
 0x1e9   : > { %v1761_v23 = vsel %vm1744_vm7, %v1728_v35, %v1355_v40  ;;  %v1729_v57 = vsel %vm1711_vm6, %v1696_v24, %v1229_v18  ;;  %v4527_v24 = vld [vmem:[#allocation38_spill] sm:$0xff] }
 0x1ea   : > { %994 = vrot.lane.b32.xlu1 %v2617_v1, %s2982_s7  ;;  %868 = vrot.lane.b32.xlu0 %v2586_v3, %s2981_s6  ;;  %v4524_v1 = vld [vmem:[#allocation8_spill] sm:$0xff]  ;;  %v4525_v3 = vld [vmem:[#allocation39_spill] sm:$0xff] }
 0x1eb   : > { %v1633_v61 = vsel %vm1612_vm3, %v4525_v3, %v4524_v1 }
 0x1ec   : > { %v1357_v39 = vpop.permute.xlu1 %1356  ;;  %v975_v42 = vpop.permute.xlu0 %974 }
 0x1ed   : > { %v1762_v58 = vsel %vm1744_vm7, %v1729_v57, %v1357_v39  ;;  %v1664_v22 = vsel %vm1645_vm4, %v1631_v28, %v975_v42  ;;  %v2654_v39 = vld [vmem:[%s3070_s30 + $0x1a2] sm:$0xff]  ;;  %v2653_v42 = vld [vmem:[%s3070_s30 + $0x19a] sm:$0xff]  ;;  %s2695_s30 = sshll.u32 %s2969_s15, 12 }
 0x1ee   : > { %1502 = vrot.lane.b32.xlu1 %v2649_v21, %s2986_s8  ;;  %1376 = vrot.lane.b32.xlu0 %v2618_v52, %s2985_s4  ;;  %s4341_s19 = scalar_lea.hbm %s4413_s2, %s2695_s30 }
 0x1f0   : > { %v977_v20 = vpop.permute.xlu1 %976  ;;  %v1483_v9 = vpop.permute.xlu0 %1482 }
 0x1f1   : > { %v1794_v32 = vsel %vm1777_vm8, %v1761_v23, %v1483_v9  ;;  %v1665_v43 = vsel %vm1645_vm4, %v1632_v55, %v977_v20 }
 0x1f2   : > { %1122 = vrot.lane.b32.xlu1 %v2649_v21, %s2983_s18  ;;  %996 = vrot.lane.b32.xlu0 %v2618_v52, %s2982_s7 }
 0x1f3   : > { %2767 = vmatprep.mubr.msk.f32.mxu1 %vm1815_vm9, %v1794_v32  ;;  %v4526_v32 = vld [vmem:[#allocation9_spill] sm:$0xff] }
 0x1f4   : > { %v1485_v41 = vpop.permute.xlu1 %1484  ;;  %v1103_v16 = vpop.permute.xlu0 %1102  ;;  %v1634_v57 = vsel %vm1612_vm3, %v4527_v24, %v4526_v32 }
 0x1f5   : > { %v1795_v26 = vsel %vm1777_vm8, %v1762_v58, %v1485_v41  ;;  %v1697_v44 = vsel %vm1678_vm5, %v1664_v22, %v1103_v16  ;;  %v4528_v22 = vld [vmem:[#allocation15_spill] sm:$0xff] }
 0x1f6   : > { %1124 = vrot.lane.b32.xlu1 %v2556_v29, %s2983_s18  ;;  %1504 = vrot.lane.b32.xlu0 %v2556_v29, %s2986_s8 }
 0x1f7   : > { %2768 = vmatmul.mubr.msk.f32.vlgmr.msra.gmra.mxu1 %vm1815_vm9, %v1795_v26 }
 0x1f8   : > { %v1231_v48 = vpop.permute.xlu1 %1230  ;;  %v1105_v4 = vpop.permute.xlu0 %1104 }
 0x1f9   : > { %v1730_v31 = vsel %vm1711_vm6, %v1697_v44, %v1231_v48  ;;  %v1698_v15 = vsel %vm1678_vm5, %v1665_v43, %v1105_v4  ;;  %v4529_v44 = vld [vmem:[#allocation41_spill] sm:$0xff] }
 0x1fa   : > { %870 = vrot.lane.b32.xlu1 %v2493_v53, %s2981_s6  ;;  %1250 = vrot.lane.b32.xlu0 %v2493_v53, %s2984_s27 }
 0x1fc   : > { %v1359_v62 = vpop.permute.xlu1 %1358  ;;  %v1233_v7 = vpop.permute.xlu0 %1232 }
 0x1fd   : > { %v1763_v33 = vsel %vm1744_vm7, %v1730_v31, %v1359_v62  ;;  %v1731_v11 = vsel %vm1711_vm6, %v1698_v15, %v1233_v7  ;;  %v1635_v31 = vsel %vm1612_vm3, %v4529_v44, %v4528_v22 }
 0x1fe   : > { %1378 = vrot.lane.b32.xlu1 %v2619_v45, %s2985_s4  ;;  %1252 = vrot.lane.b32.xlu0 %v2588_v10, %s2984_s27 }
 0x200   : > { %v1361_v47 = vpop.permute.xlu1 %1360  ;;  %v979_v30 = vpop.permute.xlu0 %978 }
 0x201   : > { %v1764_v12 = vsel %vm1744_vm7, %v1731_v11, %v1361_v47  ;;  %v1666_v18 = vsel %vm1645_vm4, %v1633_v61, %v979_v30 }
 0x202   : > { %998 = vrot.lane.b32.xlu1 %v2619_v45, %s2982_s7  ;;  %872 = vrot.lane.b32.xlu0 %v2588_v10, %s2981_s6  ;;  %s4192_s6 = sand.u32 1, %s2961_s13  }
 0x203   : > { %s2282_s21 = scalar_lea.sflag [#allocation3], %s4192_s6 }
 0x204   : > { %v981_v49 = vpop.permute.xlu1 %980  ;;  %v1487_v25 = vpop.permute.xlu0 %1486 }
 0x205   : > { %v1796_v56 = vsel %vm1777_vm8, %v1763_v33, %v1487_v25  ;;  %v1667_v16 = vsel %vm1645_vm4, %v1634_v57, %v981_v49 }
 0x206   : > { %1506 = vrot.lane.b32.xlu1 %v2651_v46, %s2986_s8  ;;  %1380 = vrot.lane.b32.xlu0 %v2620_v14, %s2985_s4 }
 0x207   : > { %2770 = vmatprep.mubr.msk.f32.mxu1 %vm1815_vm9, %v1796_v56 }
 0x208   : > { %v1489_v37 = vpop.permute.xlu1 %1488  ;;  %v1107_v50 = vpop.permute.xlu0 %1106 }
 0x209   : > { %v1797_v27 = vsel %vm1777_vm8, %v1764_v12, %v1489_v37  ;;  %v1699_v21 = vsel %vm1678_vm5, %v1666_v18, %v1107_v50 }
 0x20a   : > { %1126 = vrot.lane.b32.xlu1 %v2651_v46, %s2983_s18  ;;  %1000 = vrot.lane.b32.xlu0 %v2620_v14, %s2982_s7  ;;  %s2460_s7 = sshll.u32 %s4192_s6, 8 }
 0x20b   : > { %2771 = vmatmul.mubr.msk.f32.gmra.mxu1 %vm1815_vm9, %v1797_v27  ;;  %s4210_s9 = scalar_lea.vmem [#allocation2], %s2460_s7 }
 0x20c   : > { %v1235_v54 = vpop.permute.xlu1 %1234  ;;  %v1109_v60 = vpop.permute.xlu0 %1108  ;;  %s2303_s10 = sshll.u32 %s4210_s9, 4  ;;  %s4344_s10 = int_to_ptr.vmem [resolvable:$true] %s2303_s10 }
 0x20d   : > { %v1732_v52 = vsel %vm1711_vm6, %v1699_v21, %v1235_v54  ;;  %v1700_v26 = vsel %vm1678_vm5, %v1667_v16, %v1109_v60  ;;  %v4530_v54 = vld [vmem:[#allocation40_spill] sm:$0xff]  ;;  %s2871_s23 = scalar_lea.vmem %s4344_s10, 4096 }
 0x20e   : > { %1128 = vrot.lane.b32.xlu1 %v2558_v8, %s2983_s18  ;;  %1508 = vrot.lane.b32.xlu0 %v2558_v8, %s2986_s8  ;;  %p2872_p12 = scmp.ne.s32.totalorder %s4344_s10, %s2871_s23 }
 0x210   : > { %v1363_v59 = vpop.permute.xlu1 %1362  ;;  %v1237_v2 = vpop.permute.xlu0 %1236  ;;  %p2873_p13 = pnand %p2872_p12, %p3050_p4 }
 0x211   : > { %v1765_v13 = vsel %vm1744_vm7, %v1732_v52, %v1363_v59  ;;  %v1733_v53 = vsel %vm1711_vm6, %v1700_v26, %v1237_v2  ;;  %v4532_v26 = vld [vmem:[#allocation42_spill] sm:$0xff] }
 0x212   : > { %1256 = vrot.lane.b32.xlu1 %v2590_v63, %s2984_s27  ;;  %1254 = vrot.lane.b32.xlu0 %v2589_v5, %s2984_s27  ;;  %p2874_p0 = pneg %p2873_p13  ;;  %s2875_s27 = sshll.u32 %s2987_s26, 4  ;;  %s2876_s27 = int_to_ptr.vmem [resolvable:$false] %s2875_s27 }
 0x213   : > { %s2877_s28 = scalar_lea.vmem %s2876_s27, 8192  ;;  %p2878_p1 = scmp.lt.s32.totalorder %s4344_s10, %s2876_s27 }
 0x214   : > { %v983_v36 = vpop.permute.xlu1 %982  ;;  %v857_v40 = vpop.permute.xlu0 %856  ;;  %p2879_p2 = scmp.lt.s32.totalorder %s2877_s28, %s2871_s23 }
 0x215   : > { %v1668_v34 = vsel %vm1645_vm4, %v1635_v31, %v983_v36  ;;  %v1636_v60 = vsel %vm1612_vm3, %v4530_v54, %v857_v40 }
 0x216   : > { %1384 = vrot.lane.b32.xlu1 %v2622_v6, %s2985_s4  ;;  %1382 = vrot.lane.b32.xlu0 %v2621_v0, %s2985_s4  ;;  %p2880_p3 = por %p2879_p2, %p2878_p1 }
 0x217   : > { %v2745_v51 = vpop.f32.mrf.mxu0 }
 0x218   : > { %2142 = vst [vmem:[%s4210_s9 + $0x8] sm:$0xff] %v2745_v51  ;;  %v1491_v17 = vpop.permute.xlu1 %1490  ;;  %v1365_v35 = vpop.permute.xlu0 %1364  ;;  %v2212_v20 = vmul.f32 %v2745_v51, %v2745_v51  ;;  %p2881_p5 = pnand %p2880_p3, %p2874_p0 }
 0x219   : > { %v1798_v38 = vsel %vm1777_vm8, %v1765_v13, %v1491_v17  ;;  %v1982_v23 = vpop.f32.mrf.mxu0  ;;  %v1766_v48 = vsel %vm1744_vm7, %v1733_v53, %v1365_v35  ;;  %v4531_v13 = vld [vmem:[#allocation43_spill] sm:$0xff] }
 0x21a   : > { %2141 = vst [vmem:[%s4210_s9] sm:$0xff] %v1982_v23  ;;  %v2173_v9 = vadd.f32 %v2745_v51, %v1982_v23  ;;  %v2211_v19 = vmul.f32 %v1982_v23, %v1982_v23  ;;  %1512 = vrot.lane.b32.xlu1 %v2654_v39, %s2986_s8  ;;  %1510 = vrot.lane.b32.xlu0 %v2653_v42, %s2986_s8 }
 0x21b   : > { %2773 = vmatprep.mubr.msk.f32.mxu1 %vm1815_vm9, %v1798_v38 }
 0x21c   : > { %v2243_v29 = vadd.f32 %v2212_v20, %v2211_v19  ;;  %v1111_v58 = vpop.permute.xlu1 %1110  ;;  %v985_v41 = vpop.permute.xlu0 %984 }
 0x21d   : > { %v1701_v33 = vsel %vm1678_vm5, %v1668_v34, %v1111_v58  ;;  %v1669_v59 = vsel %vm1645_vm4, %v1636_v60, %v985_v41 }
 0x220   : > { %v1113_v4 = vpop.permute.xlu1 %1112  ;;  %v1493_v45 = vpop.permute.xlu0 %1492 }
 0x221   : > { %v1799_v10 = vsel %vm1777_vm8, %v1766_v48, %v1493_v45  ;;  %v1702_v2 = vsel %vm1678_vm5, %v1669_v59, %v1113_v4  ;;  %v4534_v59 = vld [vmem:[#allocation44_spill] sm:$0xff] }
 0x222   : > { %2774 = vmatmul.mubr.msk.f32.gmra.mxu1 %vm1815_vm9, %v1799_v10 }
 0x224   : > { %v859_v62 = vpop.permute.xlu1 %858  ;;  %v1239_v7 = vpop.permute.xlu0 %1238 }
 0x225   : > { %v1734_v43 = vsel %vm1711_vm6, %v1701_v33, %v1239_v7  ;;  %v1637_v17 = vsel %vm1612_vm3, %v4531_v13, %v859_v62 }
 0x228   : > { %v1367_v28 = vpop.permute.xlu1 %1366  ;;  %v1241_v47 = vpop.permute.xlu0 %1240 }
 0x229   : > { %v1767_v56 = vsel %vm1744_vm7, %v1734_v43, %v1367_v28  ;;  %v1735_v6 = vsel %vm1711_vm6, %v1702_v2, %v1241_v47 }
 0x22b   : > { %v2748_v30 = vpop.f32.mrf.mxu0 }
 0x22c   : > { %2144 = vst [vmem:[%s4210_s9 + $0x18] sm:$0xff] %v2748_v30  ;;  %v987_v46 = vpop.permute.xlu1 %986  ;;  %v861_v14 = vpop.permute.xlu0 %860  ;;  %v2214_v15 = vmul.f32 %v2748_v30, %v2748_v30 }
 0x22d   : > { %v1992_v55 = vpop.f32.mrf.mxu0  ;;  %v1670_v19 = vsel %vm1645_vm4, %v1637_v17, %v987_v46  ;;  %v1638_v53 = vsel %vm1612_vm3, %v4532_v26, %v861_v14 }
 0x22e   : > { %2143 = vst [vmem:[%s4210_s9 + $0x10] sm:$0xff] %v1992_v55  ;;  %v2174_v49 = vadd.f32 %v2173_v9, %v1992_v55  ;;  %v2213_v25 = vmul.f32 %v1992_v55, %v1992_v55 }
 0x230   : > { %v2244_v11 = vadd.f32 %v2243_v29, %v2213_v25  ;;  %v1495_v12 = vpop.permute.xlu1 %1494  ;;  %v1369_v37 = vpop.permute.xlu0 %1368  ;;  %v2175_v50 = vadd.f32 %v2748_v30, %v2174_v49 }
 0x231   : > { %v1800_v27 = vsel %vm1777_vm8, %v1767_v56, %v1495_v12  ;;  %v1768_v0 = vsel %vm1744_vm7, %v1735_v6, %v1369_v37 }
 0x232   : > { %2776 = vmatprep.mubr.msk.f32.mxu1 %vm1815_vm9, %v1800_v27  ;;  %v2245_v8 = vadd.f32 %v2244_v11, %v2214_v15  ;;  %v4533_v15 = vld [vmem:[#allocation45_spill] sm:$0xff] }
 0x234   : > { %v1115_v63 = vpop.permute.xlu1 %1114  ;;  %v989_v5 = vpop.permute.xlu0 %988 }
 0x235   : > { %v1703_v32 = vsel %vm1678_vm5, %v1670_v19, %v1115_v63  ;;  %v1671_v45 = vsel %vm1645_vm4, %v1638_v53, %v989_v5 }
 0x238   : > { %v1117_v1 = vpop.permute.xlu1 %1116  ;;  %v1497_v3 = vpop.permute.xlu0 %1496 }
 0x239   : > { %v1801_v61 = vsel %vm1777_vm8, %v1768_v0, %v1497_v3  ;;  %v1704_v10 = vsel %vm1678_vm5, %v1671_v45, %v1117_v1 }
 0x23a   : > { %2777 = vmatmul.mubr.msk.f32.gmra.mxu1 %vm1815_vm9, %v1801_v61 }
 0x23c   : > { %v863_v36 = vpop.permute.xlu1 %862  ;;  %v1243_v18 = vpop.permute.xlu0 %1242 }
 0x23d   : > { %v1736_v57 = vsel %vm1711_vm6, %v1703_v32, %v1243_v18  ;;  %v1639_v11 = vsel %vm1612_vm3, %v4533_v15, %v863_v36  ;;  %v4535_v32 = vld [vmem:[#allocation47_spill] sm:$0xff] }
 0x23f   : > { %v2751_v40 = vpop.f32.mrf.mxu0 }
 0x240   : > { %2146 = vst [vmem:[%s4210_s9 + $0x28] sm:$0xff] %v2751_v40  ;;  %v1371_v21 = vpop.permute.xlu1 %1370  ;;  %v1245_v52 = vpop.permute.xlu0 %1244  ;;  %v2216_v35 = vmul.f32 %v2751_v40, %v2751_v40 }
 0x241   : > { %v2002_v51 = vpop.f32.mrf.mxu0  ;;  %v1769_v29 = vsel %vm1744_vm7, %v1736_v57, %v1371_v21  ;;  %v1737_v62 = vsel %vm1711_vm6, %v1704_v10, %v1245_v52  ;;  %v4536_v10 = vld [vmem:[#allocation46_spill] sm:$0xff] }
 0x242   : > { %2145 = vst [vmem:[%s4210_s9 + $0x20] sm:$0xff] %v2002_v51  ;;  %v2176_v39 = vadd.f32 %v2175_v50, %v2002_v51  ;;  %v2215_v42 = vmul.f32 %v2002_v51, %v2002_v51 }
 0x244   : > { %v2246_v38 = vadd.f32 %v2245_v8, %v2215_v42  ;;  %v991_v23 = vpop.permute.xlu1 %990  ;;  %v865_v20 = vpop.permute.xlu0 %864  ;;  %v2177_v9 = vadd.f32 %v2751_v40, %v2176_v39 }
 0x245   : > { %v1672_v50 = vsel %vm1645_vm4, %v1639_v11, %v991_v23  ;;  %v1640_v2 = vsel %vm1612_vm3, %v4534_v59, %v865_v20 }
 0x246   : > { %v2247_v24 = vadd.f32 %v2246_v38, %v2216_v35 }
 0x248   : > { %v1499_v58 = vpop.permute.xlu1 %1498  ;;  %v1373_v41 = vpop.permute.xlu0 %1372 }
 0x249   : > { %v1802_v16 = vsel %vm1777_vm8, %v1769_v29, %v1499_v58  ;;  %v1770_v7 = vsel %vm1744_vm7, %v1737_v62, %v1373_v41 }
 0x24a   : > { %2779 = vmatprep.mubr.msk.f32.mxu1 %vm1815_vm9, %v1802_v16 }
 0x24c   : > { %v1119_v48 = vpop.permute.xlu1 %1118  ;;  %v993_v4 = vpop.permute.xlu0 %992 }
 0x24d   : > { %v1705_v27 = vsel %vm1678_vm5, %v1672_v50, %v1119_v48  ;;  %v1673_v1 = vsel %vm1645_vm4, %v1640_v2, %v993_v4  ;;  %v4538_v50 = vld [vmem:[#allocation33_spill] sm:$0xff] }
 0x250   : > { %v1121_v28 = vpop.permute.xlu1 %1120  ;;  %v1501_v47 = vpop.permute.xlu0 %1500 }
 0x251   : > { %v1803_v30 = vsel %vm1777_vm8, %v1770_v7, %v1501_v47  ;;  %v1706_v3 = vsel %vm1678_vm5, %v1673_v1, %v1121_v28 }
 0x252   : > { %2780 = vmatmul.mubr.msk.f32.gmra.mxu1 %vm1815_vm9, %v1803_v30 }
 0x253   : > { %v2754_v22 = vpop.f32.mrf.mxu0 }
 0x254   : > { %2148 = vst [vmem:[%s4210_s9 + $0x38] sm:$0xff] %v2754_v22  ;;  %v867_v44 = vpop.permute.xlu1 %866  ;;  %v1247_v31 = vpop.permute.xlu0 %1246  ;;  %v2218_v55 = vmul.f32 %v2754_v22, %v2754_v22 }
 0x255   : > { %v2012_v46 = vpop.f32.mrf.mxu0  ;;  %v1738_v8 = vsel %vm1711_vm6, %v1705_v27, %v1247_v31 }
 0x256   : > { %2147 = vst [vmem:[%s4210_s9 + $0x30] sm:$0xff] %v2012_v46  ;;  %v2178_v14 = vadd.f32 %v2177_v9, %v2012_v46  ;;  %v2217_v34 = vmul.f32 %v2012_v46, %v2012_v46 }
 0x258   : > { %v2248_v33 = vadd.f32 %v2247_v24, %v2217_v34  ;;  %v1375_v49 = vpop.permute.xlu1 %1374  ;;  %v1249_v25 = vpop.permute.xlu0 %1248  ;;  %v2179_v43 = vadd.f32 %v2754_v22, %v2178_v14  ;;  %v1641_v24 = vsel %vm1612_vm3, %v4535_v32, %v867_v44 }
 0x259   : > { %v1771_v54 = vsel %vm1744_vm7, %v1738_v8, %v1375_v49  ;;  %v1739_v61 = vsel %vm1711_vm6, %v1706_v3, %v1249_v25 }
 0x25a   : > { %v2249_v56 = vadd.f32 %v2248_v33, %v2218_v55 }
 0x25c   : > { %v995_v12 = vpop.permute.xlu1 %994  ;;  %v869_v37 = vpop.permute.xlu0 %868 }
 0x25d   : > { %v1674_v58 = vsel %vm1645_vm4, %v1641_v24, %v995_v12  ;;  %v1642_v62 = vsel %vm1612_vm3, %v4536_v10, %v869_v37  ;;  %v4537_v12 = vld [vmem:[#allocation48_spill] sm:$0xff] }
 0x260   : > { %v1503_v60 = vpop.permute.xlu1 %1502  ;;  %v1377_v63 = vpop.permute.xlu0 %1376 }
 0x261   : > { %v1804_v5 = vsel %vm1777_vm8, %v1771_v54, %v1503_v60  ;;  %v1772_v18 = vsel %vm1744_vm7, %v1739_v61, %v1377_v63 }
 0x262   : > { %2782 = vmatprep.mubr.msk.f32.mxu1 %vm1815_vm9, %v1804_v5 }
 0x264   : > { %v1123_v6 = vpop.permute.xlu1 %1122  ;;  %v997_v0 = vpop.permute.xlu0 %996 }
 0x265   : > { %v1707_v41 = vsel %vm1678_vm5, %v1674_v58, %v1123_v6  ;;  %v1675_v47 = vsel %vm1645_vm4, %v1642_v62, %v997_v0 }
 0x267   : > { %v2757_v36 = vpop.f32.mrf.mxu0 }
 0x268   : > { %2150 = vst [vmem:[%s4210_s9 + $0x48] sm:$0xff] %v2757_v36  ;;  %v1125_v40 = vpop.permute.xlu1 %1124  ;;  %v1505_v21 = vpop.permute.xlu0 %1504  ;;  %v2220_v13 = vmul.f32 %v2757_v36, %v2757_v36 }
 0x269   : > { %v1805_v52 = vsel %vm1777_vm8, %v1772_v18, %v1505_v21  ;;  %v2022_v51 = vpop.f32.mrf.mxu0  ;;  %v1708_v22 = vsel %vm1678_vm5, %v1675_v47, %v1125_v40 }
 0x26a   : > { %2149 = vst [vmem:[%s4210_s9 + $0x40] sm:$0xff] %v2022_v51  ;;  %v2180_v39 = vadd.f32 %v2179_v43, %v2022_v51  ;;  %v2219_v42 = vmul.f32 %v2022_v51, %v2022_v51  ;;  %2783 = vmatmul.mubr.msk.f32.gmra.mxu1 %vm1815_vm9, %v1805_v52 }
 0x26c   : > { %v2250_v17 = vadd.f32 %v2249_v56, %v2219_v42  ;;  %v871_v35 = vpop.permute.xlu1 %870  ;;  %v1251_v38 = vpop.permute.xlu0 %1250  ;;  %v2181_v23 = vadd.f32 %v2757_v36, %v2180_v39 }
 0x26d   : > { %v1740_v16 = vsel %vm1711_vm6, %v1707_v41, %v1251_v38  ;;  %v1643_v37 = vsel %vm1612_vm3, %v4537_v12, %v871_v35 }
 0x26e   : > { %v2251_v20 = vadd.f32 %v2250_v17, %v2220_v13 }
 0x270   : > { %v1379_v9 = vpop.permute.xlu1 %1378  ;;  %v1253_v19 = vpop.permute.xlu0 %1252 }
 0x271   : > { %v1773_v26 = vsel %vm1744_vm7, %v1740_v16, %v1379_v9  ;;  %v1741_v46 = vsel %vm1711_vm6, %v1708_v22, %v1253_v19 }
 0x274   : > { %v999_v57 = vpop.permute.xlu1 %998  ;;  %v873_v29 = vpop.permute.xlu0 %872 }
 0x275   : > { %v1644_v27 = vsel %vm1612_vm3, %v4538_v50, %v873_v29  ;;  %v1676_v60 = vsel %vm1645_vm4, %v1643_v37, %v999_v57 }
 0x278   : > { %v1507_v53 = vpop.permute.xlu1 %1506  ;;  %v1381_v48 = vpop.permute.xlu0 %1380 }
 0x279   : > { %v1806_v4 = vsel %vm1777_vm8, %v1773_v26, %v1507_v53  ;;  %v1774_v14 = vsel %vm1744_vm7, %v1741_v46, %v1381_v48 }
 0x27a   : > { %2785 = vmatprep.mubr.msk.f32.mxu1 %vm1815_vm9, %v1806_v4 }
 0x27b   : > { %v2760_v45 = vpop.f32.mrf.mxu0 }
 0x27c   : > { %2152 = vst [vmem:[%s4210_s9 + $0x58] sm:$0xff] %v2760_v45  ;;  %v1127_v7 = vpop.permute.xlu1 %1126  ;;  %v1001_v28 = vpop.permute.xlu0 %1000  ;;  %v2222_v34 = vmul.f32 %v2760_v45, %v2760_v45 }
 0x27d   : > { %v2032_v30 = vpop.f32.mrf.mxu0  ;;  %v1677_v63 = vsel %vm1645_vm4, %v1644_v27, %v1001_v28  ;;  %v1709_v5 = vsel %vm1678_vm5, %v1676_v60, %v1127_v7 }
 0x27e   : > { %2151 = vst [vmem:[%s4210_s9 + $0x50] sm:$0xff] %v2032_v30  ;;  %v2182_v44 = vadd.f32 %v2181_v23, %v2032_v30  ;;  %v2221_v31 = vmul.f32 %v2032_v30, %v2032_v30 }
 0x280   : > { %v2252_v55 = vadd.f32 %v2251_v20, %v2221_v31  ;;  %v1129_v33 = vpop.permute.xlu1 %1128  ;;  %v1509_v49 = vpop.permute.xlu0 %1508  ;;  %v2183_v25 = vadd.f32 %v2760_v45, %v2182_v44 }
 0x281   : > { %v1807_v43 = vsel %vm1777_vm8, %v1774_v14, %v1509_v49  ;;  %v1710_v59 = vsel %vm1678_vm5, %v1677_v63, %v1129_v33 }
 0x282   : > { %2786 = vmatmul.mubr.msk.f32.gmra.mxu1 %vm1815_vm9, %v1807_v43  ;;  %v2253_v56 = vadd.f32 %v2252_v55, %v2222_v34 }
 0x284   : > { %v1257_v15 = vpop.permute.xlu1 %1256  ;;  %v1255_v11 = vpop.permute.xlu0 %1254 }
 0x285   : > { %v1743_v2 = vsel %vm1711_vm6, %v1710_v59, %v1257_v15  ;;  %v1742_v6 = vsel %vm1711_vm6, %v1709_v5, %v1255_v11 }
 0x288   : > { %v1385_v8 = vpop.permute.xlu1 %1384  ;;  %v1383_v54 = vpop.permute.xlu0 %1382 }
 0x289   : > { %v1776_v0 = vsel %vm1744_vm7, %v1743_v2, %v1385_v8  ;;  %v1775_v1 = vsel %vm1744_vm7, %v1742_v6, %v1383_v54 }
 0x28c   : > { %v1513_v3 = vpop.permute.xlu1 %1512  ;;  %v1511_v61 = vpop.permute.xlu0 %1510 }
 0x28d   : > { %v1809_v36 = vsel %vm1777_vm8, %v1776_v0, %v1513_v3  ;;  %v1808_v18 = vsel %vm1777_vm8, %v1775_v1, %v1511_v61 }
 0x28e   : > { %2788 = vmatprep.mubr.msk.f32.mxu1 %vm1815_vm9, %v1808_v18 }
 0x28f   : > { %v2763_v40 = vpop.f32.mrf.mxu0  ;;  %2789 = vmatmul.mubr.msk.f32.gmra.mxu1 %vm1815_vm9, %v1809_v36 }
 0x290   : > { %2154 = vst [vmem:[%s4210_s9 + $0x68] sm:$0xff] %v2763_v40  ;;  %v2224_v39 = vmul.f32 %v2763_v40, %v2763_v40 }
 0x291   : > { %v2042_v21 = vpop.f32.mrf.mxu0 }
 0x292   : > { %2153 = vst [vmem:[%s4210_s9 + $0x60] sm:$0xff] %v2042_v21  ;;  %v2184_v52 = vadd.f32 %v2183_v25, %v2042_v21  ;;  %v2223_v51 = vmul.f32 %v2042_v21, %v2042_v21 }
 0x294   : > { %v2254_v42 = vadd.f32 %v2253_v56, %v2223_v51  ;;  %v2185_v13 = vadd.f32 %v2763_v40, %v2184_v52 }
 0x296   : > { %v2255_v17 = vadd.f32 %v2254_v42, %v2224_v39 }
 0x2a3   : > { %v2766_v35 = vpop.f32.mrf.mxu0 }
 0x2a4   : > { %2156 = vst [vmem:[%s4210_s9 + $0x78] sm:$0xff] %v2766_v35  ;;  %v2226_v9 = vmul.f32 %v2766_v35, %v2766_v35 }
 0x2a5   : > { %v2052_v38 = vpop.f32.mrf.mxu0 }
 0x2a6   : > { %2155 = vst [vmem:[%s4210_s9 + $0x70] sm:$0xff] %v2052_v38  ;;  %v2186_v23 = vadd.f32 %v2185_v13, %v2052_v38  ;;  %v2225_v20 = vmul.f32 %v2052_v38, %v2052_v38 }
 0x2a8   : > { %v2187_v19 = vadd.f32 %v2766_v35, %v2186_v23  ;;  %v2256_v32 = vadd.f32 %v2255_v17, %v2225_v20 }
 0x2aa   : > { %v2257_v24 = vadd.f32 %v2256_v32, %v2226_v9 }
 0x2b7   : > { %v2769_v57 = vpop.f32.mrf.mxu1 }
 0x2b8   : > { %2158 = vst [vmem:[%s4210_s9 + $0x88] sm:$0xff] %v2769_v57  ;;  %v2228_v16 = vmul.f32 %v2769_v57, %v2769_v57 }
 0x2b9   : > { %v2062_v29 = vpop.f32.mrf.mxu1 }
 0x2ba   : > { %2157 = vst [vmem:[%s4210_s9 + $0x80] sm:$0xff] %v2062_v29  ;;  %v2188_v58 = vadd.f32 %v2187_v19, %v2062_v29  ;;  %v2227_v41 = vmul.f32 %v2062_v29, %v2062_v29 }
 0x2bc   : > { %v2258_v26 = vadd.f32 %v2257_v24, %v2227_v41  ;;  %v2189_v53 = vadd.f32 %v2769_v57, %v2188_v58 }
 0x2be   : > { %v2259_v48 = vadd.f32 %v2258_v26, %v2228_v16 }
 0x2cb   : > { %v2772_v4 = vpop.f32.mrf.mxu1 }
 0x2cc   : > { %2160 = vst [vmem:[%s4210_s9 + $0x98] sm:$0xff] %v2772_v4  ;;  %v2230_v7 = vmul.f32 %v2772_v4, %v2772_v4 }
 0x2cd   : > { %v2072_v45 = vpop.f32.mrf.mxu1 }
 0x2ce   : > { %2159 = vst [vmem:[%s4210_s9 + $0x90] sm:$0xff] %v2072_v45  ;;  %v2190_v10 = vadd.f32 %v2189_v53, %v2072_v45  ;;  %v2229_v62 = vmul.f32 %v2072_v45, %v2072_v45 }
 0x2d0   : > { %v2260_v28 = vadd.f32 %v2259_v48, %v2229_v62  ;;  %v2191_v47 = vadd.f32 %v2772_v4, %v2190_v10 }
 0x2d2   : > { %v2261_v30 = vadd.f32 %v2260_v28, %v2230_v7 }
 0x2e2   : > { %v2775_v22 = vpop.f32.mrf.mxu1 }
 0x2e3   : > { %2162 = vst [vmem:[%s4210_s9 + $0xa8] sm:$0xff] %v2775_v22  ;;  %v2232_v14 = vmul.f32 %v2775_v22, %v2775_v22 }
 0x2e4   : > { %v2082_v44 = vpop.f32.mrf.mxu1 }
 0x2e5   : > { %2161 = vst [vmem:[%s4210_s9 + $0xa0] sm:$0xff] %v2082_v44  ;;  %v2192_v31 = vadd.f32 %v2191_v47, %v2082_v44  ;;  %v2231_v46 = vmul.f32 %v2082_v44, %v2082_v44 }
 0x2e7   : > { %v2262_v34 = vadd.f32 %v2261_v30, %v2231_v46  ;;  %v2193_v55 = vadd.f32 %v2775_v22, %v2192_v31 }
 0x2e9   : > { %v2263_v33 = vadd.f32 %v2262_v34, %v2232_v14 }
 0x2fa   : > { %v2778_v49 = vpop.f32.mrf.mxu1 }
 0x2fb   : > { %2164 = vst [vmem:[%s4210_s9 + $0xb8] sm:$0xff] %v2778_v49  ;;  %v2234_v15 = vmul.f32 %v2778_v49, %v2778_v49 }
 0x2fc   : > { %v2092_v25 = vpop.f32.mrf.mxu1 }
 0x2fd   : > { %2163 = vst [vmem:[%s4210_s9 + $0xb0] sm:$0xff] %v2092_v25  ;;  %v2194_v43 = vadd.f32 %v2193_v55, %v2092_v25  ;;  %v2233_v56 = vmul.f32 %v2092_v25, %v2092_v25 }
 0x2ff   : > { %v2264_v11 = vadd.f32 %v2263_v33, %v2233_v56  ;;  %v2195_v12 = vadd.f32 %v2778_v49, %v2194_v43 }
 0x301   : > { %v2265_v37 = vadd.f32 %v2264_v11, %v2234_v15 }
 0x312   : > { %v2781_v50 = vpop.f32.mrf.mxu1 }
 0x313   : > { %2166 = vst [vmem:[%s4210_s9 + $0xc8] sm:$0xff] %v2781_v50  ;;  %v2236_v2 = vmul.f32 %v2781_v50, %v2781_v50 }
 0x314   : > { %v2102_v27 = vpop.f32.mrf.mxu1 }
 0x315   : > { %2165 = vst [vmem:[%s4210_s9 + $0xc0] sm:$0xff] %v2102_v27  ;;  %v2235_v60 = vmul.f32 %v2102_v27, %v2102_v27  ;;  %v2196_v63 = vadd.f32 %v2195_v12, %v2102_v27 }
 0x317   : > { %v2266_v5 = vadd.f32 %v2265_v37, %v2235_v60  ;;  %v2197_v6 = vadd.f32 %v2781_v50, %v2196_v63 }
 0x319   : > { %v2267_v61 = vadd.f32 %v2266_v5, %v2236_v2 }
 0x32a   : > { %v2784_v8 = vpop.f32.mrf.mxu1 }
 0x32b   : > { %2168 = vst [vmem:[%s4210_s9 + $0xd8] sm:$0xff] %v2784_v8  ;;  %v2238_v18 = vmul.f32 %v2784_v8, %v2784_v8 }
 0x32c   : > { %v2112_v54 = vpop.f32.mrf.mxu1 }
 0x32d   : > { %2167 = vst [vmem:[%s4210_s9 + $0xd0] sm:$0xff] %v2112_v54  ;;  %v2237_v0 = vmul.f32 %v2112_v54, %v2112_v54  ;;  %v2198_v3 = vadd.f32 %v2197_v6, %v2112_v54 }
 0x32f   : > { %v2268_v36 = vadd.f32 %v2267_v61, %v2237_v0  ;;  %v2199_v40 = vadd.f32 %v2784_v8, %v2198_v3 }
 0x331   : > { %v2269_v51 = vadd.f32 %v2268_v36, %v2238_v18 }
 0x342   : > { %v2787_v59 = vpop.f32.mrf.mxu1 }
 0x343   : > { %2170 = vst [vmem:[%s4210_s9 + $0xe8] sm:$0xff] %v2787_v59  ;;  %v2240_v13 = vmul.f32 %v2787_v59, %v2787_v59 }
 0x344   : > { %v2122_v1 = vpop.f32.mrf.mxu1 }
 0x345   : > { %2169 = vst [vmem:[%s4210_s9 + $0xe0] sm:$0xff] %v2122_v1  ;;  %v2239_v21 = vmul.f32 %v2122_v1, %v2122_v1  ;;  %v2200_v52 = vadd.f32 %v2199_v40, %v2122_v1 }
 0x347   : > { %v2270_v39 = vadd.f32 %v2269_v51, %v2239_v21  ;;  %v2201_v17 = vadd.f32 %v2787_v59, %v2200_v52 }
 0x349   : > { %v2271_v20 = vadd.f32 %v2270_v39, %v2240_v13 }
 0x34f   : > { %v2790_v42 = vpop.f32.mrf.mxu1 }
 0x350   : > { %2172 = vst [vmem:[%s4210_s9 + $0xf8] sm:$0xff] %v2790_v42 }
 0x351   : > { %v2132_v35 = vpop.f32.mrf.mxu1 }
 0x352   : > { %2171 = vst [vmem:[%s4210_s9 + $0xf0] sm:$0xff] %v2132_v35  ;;  %v2202_v38 = vadd.f32 %v2201_v17, %v2132_v35  ;;  %v2241_v23 = vmul.f32 %v2132_v35, %v2132_v35 }
 0x353   : > { %2884 = shalt.err (!%p2881_p5)
}
 0x354   : > { %s2885_s29 = scalar_lea.hbm %s4341_s19, 4096  ;;  %s2889_s7 = scalar_lea.hbm %s4413_s2, 8192 }
 0x355   : > { %p2886_p6 = scmp.ne.s32.totalorder %s4341_s19, %s2885_s29  ;;  %p2890_p10 = scmp.lt.s32.totalorder %s4341_s19, %s4413_s2 }
 0x356   : > { %p2891_p11 = scmp.lt.s32.totalorder %s2889_s7, %s2885_s29 }
 0x357   : > { %p2887_p7 = pnand %p2886_p6, %p3050_p4 }
 0x358   : > { %p2892_p12 = por %p2891_p11, %p2890_p10 }
 0x359   : > { %p2888_p9 = pneg %p2887_p7 }
 0x35b   : > { %p2893_p13 = pnand %p2892_p12, %p2888_p9 }
 0x35d   : > { %2896 = shalt.err (!%p2893_p13)
}
 0x35e   : > { %s2988_s11 = smov 128   ;;  %v2242_v9 = vmul.f32 %v2790_v42, %v2790_v42  ;;  %v2203_v19 = vadd.f32 %v2790_v42, %v2202_v38  ;;  %v2272_v32 = vadd.f32 %v2271_v20, %v2241_v23  ;;  %s2461_s18 = sshll.u32 %s4192_s6, 1 }
 0x35f   : > { %2802 = dma.vmem_to_hbm [thread:$0]  (%p3050_p4), %s4344_s10, 4096, %s4341_s19, %s2282_s21, %s2988_s11, %s2988_s11, %s2980_s5  }
 0x360   : > { %v2204_v24 = vrot.slane %v2203_v19, 4  ;;  %v2273_v57 = vadd.f32 %v2272_v32, %v2242_v9  ;;  %s2692_s23 = sshll.u32 %s2969_s15, 5  ;;  %s214_s26 = scalar_lea.vmem [#allocation4], %s2461_s18 }
 0x361   : > { %s2321_s27 = sshll.u32 %s214_s26, 4  ;;  %s2319_s19 = scalar_lea.hbm %s4414_s3, %s2692_s23  ;;  %s2322_s27 = int_to_ptr.vmem [resolvable:$true] %s2321_s27 }
 0x362   : > { %v2205_v29 = vadd.f32 %v2204_v24, %v2203_v19  ;;  %v2274_v58 = vrot.slane %v2273_v57, 4  ;;  %s2287_s21 = scalar_lea.sflag [#allocation5], %s4192_s6  ;;  %s2897_s28 = scalar_lea.vmem %s2322_s27, 32 }
 0x363   : > { %p2898_p0 = scmp.ne.s32.totalorder %s2322_s27, %s2897_s28  ;;  %s2989_s29 = smov [#allocation4]  }
 0x364   : > { %v2206_v41 = vrot.slane %v2205_v29, 2  ;;  %v2275_v16 = vadd.f32 %v2274_v58, %v2273_v57  ;;  %s2901_s15 = sshll.u32 %s2989_s29, 4  ;;  %s2902_s15 = int_to_ptr.vmem [resolvable:$false] %s2901_s15 }
 0x365   : > { %p2899_p1 = pnand %p2898_p0, %p3050_p4  ;;  %s2903_s4 = scalar_lea.vmem %s2902_s15, 64 }
 0x366   : > { %v2207_v26 = vadd.f32 %v2206_v41, %v2205_v29  ;;  %v2276_v53 = vrot.slane %v2275_v16, 2  ;;  %p2904_p3 = scmp.lt.s32.totalorder %s2322_s27, %s2902_s15  ;;  %p2905_p5 = scmp.lt.s32.totalorder %s2903_s4, %s2897_s28 }
 0x367   : > { %p2900_p2 = pneg %p2899_p1 }
 0x368   : > { %v2208_v48 = vrot.slane %v2207_v26, 1  ;;  %v2277_v4 = vadd.f32 %v2276_v53, %v2275_v16  ;;  %p2906_p6 = por %p2905_p5, %p2904_p3 }
 0x36a   : > { %v2209_v45 = vadd.f32 %v2208_v48, %v2207_v26  ;;  %v2278_v10 = vrot.slane %v2277_v4, 1  ;;  %p2907_p7 = pnand %p2906_p6, %p2900_p2 }
 0x36c   : > { %2210 = vst [vmem:[%s214_s26] sm:$0x1] %v2209_v45  ;;  %v2279_v62 = vadd.f32 %v2278_v10, %v2277_v4 }
 0x36e   : > { %2280 = vst [vmem:[%s214_s26 + $0x1] sm:$0x1] %v2279_v62 }
 0x36f   : > { %2910 = shalt.err (!%p2907_p7)
}
 0x370   : > { %s2911_s8 = scalar_lea.hbm %s2319_s19, 32  ;;  %s2915_s9 = scalar_lea.hbm %s4414_s3, 64 }
 0x371   : > { %p2912_p9 = scmp.ne.s32.totalorder %s2319_s19, %s2911_s8  ;;  %p2916_p12 = scmp.lt.s32.totalorder %s2319_s19, %s4414_s3 }
 0x372   : > { %p2917_p13 = scmp.lt.s32.totalorder %s2915_s9, %s2911_s8 }
 0x373   : > { %p2913_p10 = pnand %p2912_p9, %p3050_p4 }
 0x374   : > { %p2918_p0 = por %p2917_p13, %p2916_p12 }
 0x375   : > { %p2914_p11 = pneg %p2913_p10 }
 0x377   : > { %p2919_p1 = pnand %p2918_p0, %p2914_p11 }
 0x379   : > { %2922 = shalt.err (!%p2919_p1)
}
 0x37a   : > { %2803 = dma.vmem_to_hbm [thread:$0]  (%p3050_p4), %s2322_s27, 32, %s2319_s19, %s2287_s21  }
 0x37b PF: > { %p2813_p2 = scmp.ge.s32.totalorder %s2977_s17, 2  ;;  %s2333_s18 = sand.u32 1, %s2957_s12  }
 0x37c   : > { %s2334_s23 = scalar_lea.sflag [#allocation3], %s2333_s18 }
 0x37d   : > { %p2807_p3 = pnand %p2813_p2, %p3057_p8 }
 0x37f   : > { %p2808_p5 = pneg %p2807_p3 }
 0x381   : > { %2948 = dma.done.wait (%p2808_p5), %s2334_s23, 4096  }
 0x382   : > { %2950 = vsyncadd (%p2808_p5), %s2334_s23, 4294963200  ;;  %s2343_s26 = scalar_lea.sflag [#allocation5], %s2333_s18 }
 0x383   : > { %2952 = dma.done.wait (%p2808_p5), %s2343_s26, 32  }
 0x384   : > { %2954 = vsyncadd (%p2808_p5), %s2343_s26, 4294967264  ;;  %s20_s17 = sadd.s32 1, %s2977_s17   ;;  %s4539_s12 = smov %s2961_s13 }
 0x385   : > { %p17_p6 = scmp.ge.s32.totalorder %s20_s17, 4   ;;  %s4540_s13 = smov %s2965_s14 }
 0x386   : > { %s4541_s14 = smov %s3063_s25  ;;  %s4542_s15 = smov %s2973_s16 }
 0x387   : > { %s4543_s16 = smov %s4545_s20  ;;  %19 = sbr.rel (!%p17_p6) target bundleno = 6 (0x6), region = 86 }
 0x38c   :  { %2348 = vsyncpa [#allocation3], 1 }
 0x38d   :  { %2350 = vsyncpa [#allocation3 + $0x1], 1 }
 0x38e   :  { %2351 = vsyncpa [#allocation5], 1 }
 0x38f   :  { %2353 = vsyncpa [#allocation5 + $0x1], 1 }

</bundles_post_ra>
